<compile_context>
chip_gen: v7x
topology: tpu7x:2x2x1
jax: 0.10.0
libtpu: 0.0.40
codegen_flags: <defaults>
</compile_context>

<pallas_src>
import jax
import jax.numpy as jnp
from jax.experimental import pallas as pl
from jax.experimental.pallas import tpu as pltpu


def _affine_layer(x1, x2, w1_ref, b1_ref, w2_ref, b2_ref):
    """y2 = x2 * exp(log_scale(x1)) + shift(x1).

    x1, x2: [B, Dh] f32.  Weights are bf16 and go straight to the MXU
    (no f32 materialization); accumulation and the epilogue are f32.
    """
    h = jnp.dot(x1.astype(jnp.bfloat16), w1_ref[0],
                preferred_element_type=jnp.float32) + b1_ref[0]
    h = jnp.maximum(h, 0.0)                                   # ReLU
    st = jnp.dot(h.astype(jnp.bfloat16), w2_ref[0],
                 preferred_element_type=jnp.float32) + b2_ref[0]
    dh = x1.shape[-1]
    shift = st[:, :dh]                  # 128-lane-aligned static slices: free
    log_scale = st[:, dh:]
    return x2 * jnp.exp(log_scale) + shift


def coupling_pair_kernel(x_ref, w1_ref, b1_ref, w2_ref, b2_ref, y_ref):
    """grid=(2,): step 0 = reverse=False layer, step 1 = reverse=True layer.

    The activation is carried in the output VMEM block (same block index for
    both grid steps, layer axis marked "arbitrary"), so layer B reads layer
    A's result without any HBM traffic.  Weights for step 1 are DMA'd by the
    Pallas pipeline while step 0 computes.
    """
    dh = x_ref.shape[-1] // 2

    @pl.when(pl.program_id(0) == 0)
    def _():
        # reverse=False: x1 = left, x2 = right; output = [x1, y2]
        x1 = x_ref[:, :dh]
        y_ref[:, :dh] = x1
        y_ref[:, dh:] = _affine_layer(x1, x_ref[:, dh:],
                                      w1_ref, b1_ref, w2_ref, b2_ref)

    @pl.when(pl.program_id(0) == 1)
    def _():
        # reverse=True: x2 = left (= old x1), x1 = right (= y2 of layer A);
        # output = [y2b, x1]; the right half is already in place.
        x1 = y_ref[:, dh:]
        x2 = y_ref[:, :dh]
        y_ref[:, :dh] = _affine_layer(x1, x2,
                                      w1_ref, b1_ref, w2_ref, b2_ref)


def coupling_pair_forward(x, params, pair):
    """One Pallas call = one (forward, reverse) coupling-layer pair."""
    B, D = x.shape
    dh = D // 2
    H = params["w1"].shape[-1]
    base = 2 * pair                                    # static per-call offset

    def widx(l, base=base):
        return (base + l, 0, 0)

    return pl.pallas_call(
        coupling_pair_kernel,
        out_shape=jax.ShapeDtypeStruct((B, D), jnp.float32),
        grid=(2,),
        in_specs=[
            pl.BlockSpec((B, D), lambda l: (0, 0)),          # activation
            pl.BlockSpec((1, dh, H), widx),                  # W1  [NB, Dh, H]
            pl.BlockSpec((1, 1, H), widx),                   # b1  [NB, 1, H]
            pl.BlockSpec((1, H, 2 * dh), widx),              # W2  [NB, H, 2Dh]
            pl.BlockSpec((1, 1, 2 * dh), widx),              # b2  [NB, 1, 2Dh]
        ],
        out_specs=pl.BlockSpec((B, D), lambda l: (0, 0)),
        input_output_aliases={0: 0},                         # reuse x's buffer
        compiler_params=pltpu.CompilerParams(
            dimension_semantics=("arbitrary",)),             # carries state
    )(x, params["w1"], params["b1"], params["w2"], params["b2"])


def init_linear(key, fan_in, fan_out, w_dtype=jnp.bfloat16):
    """PyTorch-like Linear init: U(-1/sqrt(fan_in), 1/sqrt(fan_in)).

    Weights stored [in_features, out_features] (transposed vs. torch) in bf16
    to halve weight HBM traffic; biases kept in f32.
    """
    kw, kb = jax.random.split(key)
    bound = 1.0 / float(fan_in) ** 0.5
    w = jax.random.uniform(kw, (fan_in, fan_out), jnp.float32, -bound, bound)
    b = jax.random.uniform(kb, (1, fan_out), jnp.float32, -bound, bound)
    return w.astype(w_dtype), b


def init_realnvp_params(key, input_dim, hidden_dim, num_blocks):
    """Stacked parameters: one array per tensor, leading axis = block index."""
    dh = input_dim // 2
    w1s, b1s, w2s, b2s = [], [], [], []
    for _ in range(num_blocks):
        key, k1, k2 = jax.random.split(key, 3)
        w1, b1 = init_linear(k1, dh, hidden_dim)
        w2, b2 = init_linear(k2, hidden_dim, 2 * dh)
        w1s.append(w1); b1s.append(b1); w2s.append(w2); b2s.append(b2)
    return dict(w1=jnp.stack(w1s), b1=jnp.stack(b1s),
                w2=jnp.stack(w2s), b2=jnp.stack(b2s))


def realnvp_forward(x, params, perm_indices):
    """Fused RealNVP forward: one kernel per coupling-layer pair, with the
    precomputed-constant element permutation applied after each pair."""
    B, D = x.shape
    num_blocks = params["w1"].shape[0]
    assert num_blocks % 2 == 0, "expects alternating (forward, reverse) pairs"
    for pair in range(num_blocks // 2):
        x = coupling_pair_forward(x, params, pair)
        # torch.randperm equivalent over all elements, constant indices.
        x = x.reshape(-1)[perm_indices[pair]].reshape(B, D)
    return x


realnvp_forward_jit = jax.jit(realnvp_forward)


if __name__ == "__main__":
    B = 8
    INPUT_DIM = 256      # Dh = 128 -> lane-aligned static slices in the kernel
    HIDDEN_DIM = 512
    NUM_BLOCKS = 4

    root = jax.random.PRNGKey(0)
    kx, kp, kperm = jax.random.split(root, 3)

    x = jax.random.normal(kx, (B, INPUT_DIM), dtype=jnp.float32)
    params = init_realnvp_params(kp, INPUT_DIM, HIDDEN_DIM, NUM_BLOCKS)

    # Deterministic stand-in for torch.randperm, computed ONCE up front.
    perm_keys = jax.random.split(kperm, NUM_BLOCKS // 2)
    perm_indices = [jax.random.permutation(k, B * INPUT_DIM) for k in perm_keys]

    out = realnvp_forward_jit(x, params, perm_indices)
    out = jax.block_until_ready(out)

    # Pure-JAX per-layer reference with the same precision path as the kernel
    # (bf16 weights and bf16-cast activations into f32-accumulating dots).
    def ref_forward(x):
        num_blocks = params["w1"].shape[0]
        dh = x.shape[1] // 2
        perm_i = 0
        for i in range(num_blocks):
            reverse = (i % 2 == 1)
            left, right = x[:, :dh], x[:, dh:]
            x1, x2 = (left, right) if not reverse else (right, left)
            h = jnp.dot(x1.astype(jnp.bfloat16), params["w1"][i],
                        preferred_element_type=jnp.float32) + params["b1"][i]
            h = jnp.maximum(h, 0.0)
            st = jnp.dot(h.astype(jnp.bfloat16), params["w2"][i],
                         preferred_element_type=jnp.float32) + params["b2"][i]
            shift, log_scale = st[:, :dh], st[:, dh:]
            y2 = x2 * jnp.exp(log_scale) + shift
            x = (jnp.concatenate([x1, y2], axis=1) if not reverse
                 else jnp.concatenate([y2, x1], axis=1))
            if (i + 1) % 2 == 0:
                x = x.reshape(-1)[perm_indices[perm_i]].reshape(x.shape)
                perm_i += 1
        return x

    ref = ref_forward(x)
    assert out.shape == (B, INPUT_DIM)
    max_err = float(jnp.max(jnp.abs(out - ref)))
    assert jnp.allclose(out, ref, atol=1e-3, rtol=1e-3), max_err
    print("KERNEL_OK")
</pallas_src>

<mosaic_0001>
module attributes {stable_mosaic.version = 11 : i64} {
  func.func private @main(%arg0: i32) attributes {dimension_semantics = [#tpu.dimension_semantics<core_parallel>], iteration_bounds = array<i64: 2>, tpu.core_type = #tpu.core_type<sc_scalar_subcore>, window_params = []} {
    return
  }
}

module attributes {stable_mosaic.version = 11 : i64} {
  func.func private @main(%arg0: i32) attributes {dimension_semantics = [#tpu.dimension_semantics<core_parallel>], iteration_bounds = array<i64: 2>, tpu.core_type = #tpu.core_type<sc_scalar_subcore>, window_params = []} {
    return
  }
}

module attributes {stable_mosaic.version = 11 : i64} {
  func.func @coupling_pair_kernel(%arg0: i32, %arg1: memref<8x256xf32, #tpu.memory_space<vmem>>, %arg2: memref<1x128x512xbf16, #tpu.memory_space<vmem>>, %arg3: memref<1x1x512xf32, #tpu.memory_space<vmem>>, %arg4: memref<1x512x256xbf16, #tpu.memory_space<vmem>>, %arg5: memref<1x1x256xf32, #tpu.memory_space<vmem>>, %arg6: memref<8x256xf32, #tpu.memory_space<vmem>>) attributes {dimension_semantics = [#tpu.dimension_semantics<arbitrary>], iteration_bounds = array<i64: 2>, scalar_prefetch = 0 : i64, scratch_operands = 0 : i64, tpu.core_type = #tpu.core_type<tc>, window_params = [{pipeline_mode = #tpu.pipeline_mode<synchronous>, transform_indices = @transform_0, window_bounds = array<i64: 8, 256>}, {transform_indices = @transform_1, window_bounds = array<i64: 1, 128, 512>}, {transform_indices = @transform_2, window_bounds = array<i64: 1, 1, 512>}, {transform_indices = @transform_3, window_bounds = array<i64: 1, 512, 256>}, {transform_indices = @transform_4, window_bounds = array<i64: 1, 1, 256>}, {pipeline_mode = #tpu.pipeline_mode<synchronous>, transform_indices = @transform_5, window_bounds = array<i64: 8, 256>}]} {
    %c0_i32 = arith.constant 0 : i32
    %0 = arith.cmpi eq, %arg0, %c0_i32 : i32
    %1 = arith.extui %0 : i1 to i32
    %c0_i32_0 = arith.constant 0 : i32
    %2 = arith.cmpi ne, %1, %c0_i32_0 : i32
    scf.if %2 {
      %c0 = arith.constant 0 : index
      %c0_2 = arith.constant 0 : index
      %6 = vector.load %arg1[%c0, %c0_2] : memref<8x256xf32, #tpu.memory_space<vmem>>, vector<8x128xf32>
      %c0_3 = arith.constant 0 : index
      %c0_4 = arith.constant 0 : index
      %7 = vector.load %arg6[%c0_3, %c0_4] : memref<8x256xf32, #tpu.memory_space<vmem>>, vector<8x128xf32>
      tpu.vector_store %arg6[%c0_3, %c0_4], %6 {strides = array<i32>} : memref<8x256xf32, #tpu.memory_space<vmem>>, vector<8x128xf32>,
      %c0_5 = arith.constant 0 : index
      %c128 = arith.constant 128 : index
      %8 = vector.load %arg1[%c0_5, %c128] : memref<8x256xf32, #tpu.memory_space<vmem>>, vector<8x128xf32>
      %9 = arith.truncf %6 : vector<8x128xf32> to vector<8x128xbf16>
      %c0_6 = arith.constant 0 : index
      %c0_7 = arith.constant 0 : index
      %c0_8 = arith.constant 0 : index
      %10 = vector.load %arg2[%c0_6, %c0_7, %c0_8] : memref<1x128x512xbf16, #tpu.memory_space<vmem>>, vector<1x128x512xbf16>
      %11 = vector.shape_cast %10 : vector<1x128x512xbf16> to vector<128x512xbf16>
      %cst = arith.constant dense<0.000000e+00> : vector<8x512xf32>
      %12 = tpu.matmul %9, %11, %cst {dimension_numbers = #tpu.dot_dimension_numbers<[1], [0], [0], [1], [0, 0, 1, 1], [], []>} : vector<8x128xbf16>, vector<128x512xbf16>, vector<8x512xf32> -> vector<8x512xf32>
      %c0_9 = arith.constant 0 : index
      %c0_10 = arith.constant 0 : index
      %c0_11 = arith.constant 0 : index
      %13 = vector.load %arg3[%c0_9, %c0_10, %c0_11] : memref<1x1x512xf32, #tpu.memory_space<vmem>>, vector<1x1x512xf32>
      %14 = vector.shape_cast %13 : vector<1x1x512xf32> to vector<1x512xf32>
      %15 = vector.broadcast %14 : vector<1x512xf32> to vector<8x512xf32>
      %16 = arith.addf %12, %15 : vector<8x512xf32>
      %cst_12 = arith.constant 0.000000e+00 : f32
      %17 = vector.broadcast %cst_12 : f32 to vector<8x512xf32>
      %18 = arith.maximumf %16, %17 : vector<8x512xf32>
      %19 = arith.truncf %18 : vector<8x512xf32> to vector<8x512xbf16>
      %c0_13 = arith.constant 0 : index
      %c0_14 = arith.constant 0 : index
      %c0_15 = arith.constant 0 : index
      %20 = vector.load %arg4[%c0_13, %c0_14, %c0_15] : memref<1x512x256xbf16, #tpu.memory_space<vmem>>, vector<1x512x256xbf16>
      %21 = vector.shape_cast %20 : vector<1x512x256xbf16> to vector<512x256xbf16>
      %cst_16 = arith.constant dense<0.000000e+00> : vector<8x256xf32>
      %22 = tpu.matmul %19, %21, %cst_16 {dimension_numbers = #tpu.dot_dimension_numbers<[1], [0], [0], [1], [0, 0, 1, 1], [], []>} : vector<8x512xbf16>, vector<512x256xbf16>, vector<8x256xf32> -> vector<8x256xf32>
      %c0_17 = arith.constant 0 : index
      %c0_18 = arith.constant 0 : index
      %c0_19 = arith.constant 0 : index
      %23 = vector.load %arg5[%c0_17, %c0_18, %c0_19] : memref<1x1x256xf32, #tpu.memory_space<vmem>>, vector<1x1x256xf32>
      %24 = vector.shape_cast %23 : vector<1x1x256xf32> to vector<1x256xf32>
      %25 = vector.broadcast %24 : vector<1x256xf32> to vector<8x256xf32>
      %26 = arith.addf %22, %25 : vector<8x256xf32>
      %27 = vector.extract_strided_slice %26 {offsets = [0, 0], sizes = [8, 128], strides = [1, 1]} : vector<8x256xf32> to vector<8x128xf32>
      %28 = vector.extract_strided_slice %26 {offsets = [0, 128], sizes = [8, 128], strides = [1, 1]} : vector<8x256xf32> to vector<8x128xf32>
      %29 = math.exp %28 : vector<8x128xf32>
      %30 = arith.mulf %8, %29 : vector<8x128xf32>
      %31 = arith.addf %30, %27 : vector<8x128xf32>
      %c0_20 = arith.constant 0 : index
      %c128_21 = arith.constant 128 : index
      %32 = vector.load %arg6[%c0_20, %c128_21] : memref<8x256xf32, #tpu.memory_space<vmem>>, vector<8x128xf32>
      tpu.vector_store %arg6[%c0_20, %c128_21], %31 {strides = array<i32>} : memref<8x256xf32, #tpu.memory_space<vmem>>, vector<8x128xf32>,
    } else {
    }
    %c1_i32 = arith.constant 1 : i32
    %3 = arith.cmpi eq, %arg0, %c1_i32 : i32
    %4 = arith.extui %3 : i1 to i32
    %c0_i32_1 = arith.constant 0 : i32
    %5 = arith.cmpi ne, %4, %c0_i32_1 : i32
    scf.if %5 {
      %c0 = arith.constant 0 : index
      %c128 = arith.constant 128 : index
      %6 = vector.load %arg6[%c0, %c128] : memref<8x256xf32, #tpu.memory_space<vmem>>, vector<8x128xf32>
      %c0_2 = arith.constant 0 : index
      %c0_3 = arith.constant 0 : index
      %7 = vector.load %arg6[%c0_2, %c0_3] : memref<8x256xf32, #tpu.memory_space<vmem>>, vector<8x128xf32>
      %8 = arith.truncf %6 : vector<8x128xf32> to vector<8x128xbf16>
      %c0_4 = arith.constant 0 : index
      %c0_5 = arith.constant 0 : index
      %c0_6 = arith.constant 0 : index
      %9 = vector.load %arg2[%c0_4, %c0_5, %c0_6] : memref<1x128x512xbf16, #tpu.memory_space<vmem>>, vector<1x128x512xbf16>
      %10 = vector.shape_cast %9 : vector<1x128x512xbf16> to vector<128x512xbf16>
      %cst = arith.constant dense<0.000000e+00> : vector<8x512xf32>
      %11 = tpu.matmul %8, %10, %cst {dimension_numbers = #tpu.dot_dimension_numbers<[1], [0], [0], [1], [0, 0, 1, 1], [], []>} : vector<8x128xbf16>, vector<128x512xbf16>, vector<8x512xf32> -> vector<8x512xf32>
      %c0_7 = arith.constant 0 : index
      %c0_8 = arith.constant 0 : index
      %c0_9 = arith.constant 0 : index
      %12 = vector.load %arg3[%c0_7, %c0_8, %c0_9] : memref<1x1x512xf32, #tpu.memory_space<vmem>>, vector<1x1x512xf32>
      %13 = vector.shape_cast %12 : vector<1x1x512xf32> to vector<1x512xf32>
      %14 = vector.broadcast %13 : vector<1x512xf32> to vector<8x512xf32>
      %15 = arith.addf %11, %14 : vector<8x512xf32>
      %cst_10 = arith.constant 0.000000e+00 : f32
      %16 = vector.broadcast %cst_10 : f32 to vector<8x512xf32>
      %17 = arith.maximumf %15, %16 : vector<8x512xf32>
      %18 = arith.truncf %17 : vector<8x512xf32> to vector<8x512xbf16>
      %c0_11 = arith.constant 0 : index
      %c0_12 = arith.constant 0 : index
      %c0_13 = arith.constant 0 : index
      %19 = vector.load %arg4[%c0_11, %c0_12, %c0_13] : memref<1x512x256xbf16, #tpu.memory_space<vmem>>, vector<1x512x256xbf16>
      %20 = vector.shape_cast %19 : vector<1x512x256xbf16> to vector<512x256xbf16>
      %cst_14 = arith.constant dense<0.000000e+00> : vector<8x256xf32>
      %21 = tpu.matmul %18, %20, %cst_14 {dimension_numbers = #tpu.dot_dimension_numbers<[1], [0], [0], [1], [0, 0, 1, 1], [], []>} : vector<8x512xbf16>, vector<512x256xbf16>, vector<8x256xf32> -> vector<8x256xf32>
      %c0_15 = arith.constant 0 : index
      %c0_16 = arith.constant 0 : index
      %c0_17 = arith.constant 0 : index
      %22 = vector.load %arg5[%c0_15, %c0_16, %c0_17] : memref<1x1x256xf32, #tpu.memory_space<vmem>>, vector<1x1x256xf32>
      %23 = vector.shape_cast %22 : vector<1x1x256xf32> to vector<1x256xf32>
      %24 = vector.broadcast %23 : vector<1x256xf32> to vector<8x256xf32>
      %25 = arith.addf %21, %24 : vector<8x256xf32>
      %26 = vector.extract_strided_slice %25 {offsets = [0, 0], sizes = [8, 128], strides = [1, 1]} : vector<8x256xf32> to vector<8x128xf32>
      %27 = vector.extract_strided_slice %25 {offsets = [0, 128], sizes = [8, 128], strides = [1, 1]} : vector<8x256xf32> to vector<8x128xf32>
      %28 = math.exp %27 : vector<8x128xf32>
      %29 = arith.mulf %7, %28 : vector<8x128xf32>
      %30 = arith.addf %29, %26 : vector<8x128xf32>
      %c0_18 = arith.constant 0 : index
      %c0_19 = arith.constant 0 : index
      %31 = vector.load %arg6[%c0_18, %c0_19] : memref<8x256xf32, #tpu.memory_space<vmem>>, vector<8x128xf32>
      tpu.vector_store %arg6[%c0_18, %c0_19], %30 {strides = array<i32>} : memref<8x256xf32, #tpu.memory_space<vmem>>, vector<8x128xf32>,
    } else {
    }
    return
  }
  func.func @transform_0(%arg0: i32) -> (i32, i32) {
    %c0_i32 = arith.constant 0 : i32
    %c0_i32_0 = arith.constant 0 : i32
    %c0_i32_1 = arith.constant 0 : i32
    return %c0_i32, %c0_i32_0 : i32, i32
  }
  func.func @transform_1(%arg0: i32) -> (i32, i32, i32) {
    %c0_i32 = arith.constant 0 : i32
    %0 = arith.addi %c0_i32, %arg0 : i32
    %c0_i32_0 = arith.constant 0 : i32
    %c0_i32_1 = arith.constant 0 : i32
    %c0_i32_2 = arith.constant 0 : i32
    return %0, %c0_i32_0, %c0_i32_1 : i32, i32, i32
  }
  func.func @transform_2(%arg0: i32) -> (i32, i32, i32) {
    %c0_i32 = arith.constant 0 : i32
    %0 = arith.addi %c0_i32, %arg0 : i32
    %c0_i32_0 = arith.constant 0 : i32
    %c0_i32_1 = arith.constant 0 : i32
    %c0_i32_2 = arith.constant 0 : i32
    return %0, %c0_i32_0, %c0_i32_1 : i32, i32, i32
  }
  func.func @transform_3(%arg0: i32) -> (i32, i32, i32) {
    %c0_i32 = arith.constant 0 : i32
    %0 = arith.addi %c0_i32, %arg0 : i32
    %c0_i32_0 = arith.constant 0 : i32
    %c0_i32_1 = arith.constant 0 : i32
    %c0_i32_2 = arith.constant 0 : i32
    return %0, %c0_i32_0, %c0_i32_1 : i32, i32, i32
  }
  func.func @transform_4(%arg0: i32) -> (i32, i32, i32) {
    %c0_i32 = arith.constant 0 : i32
    %0 = arith.addi %c0_i32, %arg0 : i32
    %c0_i32_0 = arith.constant 0 : i32
    %c0_i32_1 = arith.constant 0 : i32
    %c0_i32_2 = arith.constant 0 : i32
    return %0, %c0_i32_0, %c0_i32_1 : i32, i32, i32
  }
  func.func @transform_5(%arg0: i32) -> (i32, i32) {
    %c0_i32 = arith.constant 0 : i32
    %c0_i32_0 = arith.constant 0 : i32
    %c0_i32_1 = arith.constant 0 : i32
    return %c0_i32, %c0_i32_0 : i32, i32
  }
}

module attributes {stable_mosaic.version = 11 : i64} {
  func.func @coupling_pair_kernel(%arg0: i32, %arg1: memref<8x256xf32, #tpu.memory_space<vmem>>, %arg2: memref<1x128x512xbf16, #tpu.memory_space<vmem>>, %arg3: memref<1x1x512xf32, #tpu.memory_space<vmem>>, %arg4: memref<1x512x256xbf16, #tpu.memory_space<vmem>>, %arg5: memref<1x1x256xf32, #tpu.memory_space<vmem>>, %arg6: memref<8x256xf32, #tpu.memory_space<vmem>>) attributes {dimension_semantics = [#tpu.dimension_semantics<arbitrary>], iteration_bounds = array<i64: 2>, scalar_prefetch = 0 : i64, scratch_operands = 0 : i64, tpu.core_type = #tpu.core_type<tc>, window_params = [{pipeline_mode = #tpu.pipeline_mode<synchronous>, transform_indices = @transform_0, window_bounds = array<i64: 8, 256>}, {transform_indices = @transform_1, window_bounds = array<i64: 1, 128, 512>}, {transform_indices = @transform_2, window_bounds = array<i64: 1, 1, 512>}, {transform_indices = @transform_3, window_bounds = array<i64: 1, 512, 256>}, {transform_indices = @transform_4, window_bounds = array<i64: 1, 1, 256>}, {pipeline_mode = #tpu.pipeline_mode<synchronous>, transform_indices = @transform_5, window_bounds = array<i64: 8, 256>}]} {
    %c0_i32 = arith.constant 0 : i32
    %0 = arith.cmpi eq, %arg0, %c0_i32 : i32
    %1 = arith.extui %0 : i1 to i32
    %c0_i32_0 = arith.constant 0 : i32
    %2 = arith.cmpi ne, %1, %c0_i32_0 : i32
    scf.if %2 {
      %c0 = arith.constant 0 : index
      %c0_2 = arith.constant 0 : index
      %6 = vector.load %arg1[%c0, %c0_2] : memref<8x256xf32, #tpu.memory_space<vmem>>, vector<8x128xf32>
      %c0_3 = arith.constant 0 : index
      %c0_4 = arith.constant 0 : index
      %7 = vector.load %arg6[%c0_3, %c0_4] : memref<8x256xf32, #tpu.memory_space<vmem>>, vector<8x128xf32>
      tpu.vector_store %arg6[%c0_3, %c0_4], %6 {strides = array<i32>} : memref<8x256xf32, #tpu.memory_space<vmem>>, vector<8x128xf32>,
      %c0_5 = arith.constant 0 : index
      %c128 = arith.constant 128 : index
      %8 = vector.load %arg1[%c0_5, %c128] : memref<8x256xf32, #tpu.memory_space<vmem>>, vector<8x128xf32>
      %9 = arith.truncf %6 : vector<8x128xf32> to vector<8x128xbf16>
      %c0_6 = arith.constant 0 : index
      %c0_7 = arith.constant 0 : index
      %c0_8 = arith.constant 0 : index
      %10 = vector.load %arg2[%c0_6, %c0_7, %c0_8] : memref<1x128x512xbf16, #tpu.memory_space<vmem>>, vector<1x128x512xbf16>
      %11 = vector.shape_cast %10 : vector<1x128x512xbf16> to vector<128x512xbf16>
      %cst = arith.constant dense<0.000000e+00> : vector<8x512xf32>
      %12 = tpu.matmul %9, %11, %cst {dimension_numbers = #tpu.dot_dimension_numbers<[1], [0], [0], [1], [0, 0, 1, 1], [], []>} : vector<8x128xbf16>, vector<128x512xbf16>, vector<8x512xf32> -> vector<8x512xf32>
      %c0_9 = arith.constant 0 : index
      %c0_10 = arith.constant 0 : index
      %c0_11 = arith.constant 0 : index
      %13 = vector.load %arg3[%c0_9, %c0_10, %c0_11] : memref<1x1x512xf32, #tpu.memory_space<vmem>>, vector<1x1x512xf32>
      %14 = vector.shape_cast %13 : vector<1x1x512xf32> to vector<1x512xf32>
      %15 = vector.broadcast %14 : vector<1x512xf32> to vector<8x512xf32>
      %16 = arith.addf %12, %15 : vector<8x512xf32>
      %cst_12 = arith.constant 0.000000e+00 : f32
      %17 = vector.broadcast %cst_12 : f32 to vector<8x512xf32>
      %18 = arith.maximumf %16, %17 : vector<8x512xf32>
      %19 = arith.truncf %18 : vector<8x512xf32> to vector<8x512xbf16>
      %c0_13 = arith.constant 0 : index
      %c0_14 = arith.constant 0 : index
      %c0_15 = arith.constant 0 : index
      %20 = vector.load %arg4[%c0_13, %c0_14, %c0_15] : memref<1x512x256xbf16, #tpu.memory_space<vmem>>, vector<1x512x256xbf16>
      %21 = vector.shape_cast %20 : vector<1x512x256xbf16> to vector<512x256xbf16>
      %cst_16 = arith.constant dense<0.000000e+00> : vector<8x256xf32>
      %22 = tpu.matmul %19, %21, %cst_16 {dimension_numbers = #tpu.dot_dimension_numbers<[1], [0], [0], [1], [0, 0, 1, 1], [], []>} : vector<8x512xbf16>, vector<512x256xbf16>, vector<8x256xf32> -> vector<8x256xf32>
      %c0_17 = arith.constant 0 : index
      %c0_18 = arith.constant 0 : index
      %c0_19 = arith.constant 0 : index
      %23 = vector.load %arg5[%c0_17, %c0_18, %c0_19] : memref<1x1x256xf32, #tpu.memory_space<vmem>>, vector<1x1x256xf32>
      %24 = vector.shape_cast %23 : vector<1x1x256xf32> to vector<1x256xf32>
      %25 = vector.broadcast %24 : vector<1x256xf32> to vector<8x256xf32>
      %26 = arith.addf %22, %25 : vector<8x256xf32>
      %27 = vector.extract_strided_slice %26 {offsets = [0, 0], sizes = [8, 128], strides = [1, 1]} : vector<8x256xf32> to vector<8x128xf32>
      %28 = vector.extract_strided_slice %26 {offsets = [0, 128], sizes = [8, 128], strides = [1, 1]} : vector<8x256xf32> to vector<8x128xf32>
      %29 = math.exp %28 : vector<8x128xf32>
      %30 = arith.mulf %8, %29 : vector<8x128xf32>
      %31 = arith.addf %30, %27 : vector<8x128xf32>
      %c0_20 = arith.constant 0 : index
      %c128_21 = arith.constant 128 : index
      %32 = vector.load %arg6[%c0_20, %c128_21] : memref<8x256xf32, #tpu.memory_space<vmem>>, vector<8x128xf32>
      tpu.vector_store %arg6[%c0_20, %c128_21], %31 {strides = array<i32>} : memref<8x256xf32, #tpu.memory_space<vmem>>, vector<8x128xf32>,
    } else {
    }
    %c1_i32 = arith.constant 1 : i32
    %3 = arith.cmpi eq, %arg0, %c1_i32 : i32
    %4 = arith.extui %3 : i1 to i32
    %c0_i32_1 = arith.constant 0 : i32
    %5 = arith.cmpi ne, %4, %c0_i32_1 : i32
    scf.if %5 {
      %c0 = arith.constant 0 : index
      %c128 = arith.constant 128 : index
      %6 = vector.load %arg6[%c0, %c128] : memref<8x256xf32, #tpu.memory_space<vmem>>, vector<8x128xf32>
      %c0_2 = arith.constant 0 : index
      %c0_3 = arith.constant 0 : index
      %7 = vector.load %arg6[%c0_2, %c0_3] : memref<8x256xf32, #tpu.memory_space<vmem>>, vector<8x128xf32>
      %8 = arith.truncf %6 : vector<8x128xf32> to vector<8x128xbf16>
      %c0_4 = arith.constant 0 : index
      %c0_5 = arith.constant 0 : index
      %c0_6 = arith.constant 0 : index
      %9 = vector.load %arg2[%c0_4, %c0_5, %c0_6] : memref<1x128x512xbf16, #tpu.memory_space<vmem>>, vector<1x128x512xbf16>
      %10 = vector.shape_cast %9 : vector<1x128x512xbf16> to vector<128x512xbf16>
      %cst = arith.constant dense<0.000000e+00> : vector<8x512xf32>
      %11 = tpu.matmul %8, %10, %cst {dimension_numbers = #tpu.dot_dimension_numbers<[1], [0], [0], [1], [0, 0, 1, 1], [], []>} : vector<8x128xbf16>, vector<128x512xbf16>, vector<8x512xf32> -> vector<8x512xf32>
      %c0_7 = arith.constant 0 : index
      %c0_8 = arith.constant 0 : index
      %c0_9 = arith.constant 0 : index
      %12 = vector.load %arg3[%c0_7, %c0_8, %c0_9] : memref<1x1x512xf32, #tpu.memory_space<vmem>>, vector<1x1x512xf32>
      %13 = vector.shape_cast %12 : vector<1x1x512xf32> to vector<1x512xf32>
      %14 = vector.broadcast %13 : vector<1x512xf32> to vector<8x512xf32>
      %15 = arith.addf %11, %14 : vector<8x512xf32>
      %cst_10 = arith.constant 0.000000e+00 : f32
      %16 = vector.broadcast %cst_10 : f32 to vector<8x512xf32>
      %17 = arith.maximumf %15, %16 : vector<8x512xf32>
      %18 = arith.truncf %17 : vector<8x512xf32> to vector<8x512xbf16>
      %c0_11 = arith.constant 0 : index
      %c0_12 = arith.constant 0 : index
      %c0_13 = arith.constant 0 : index
      %19 = vector.load %arg4[%c0_11, %c0_12, %c0_13] : memref<1x512x256xbf16, #tpu.memory_space<vmem>>, vector<1x512x256xbf16>
      %20 = vector.shape_cast %19 : vector<1x512x256xbf16> to vector<512x256xbf16>
      %cst_14 = arith.constant dense<0.000000e+00> : vector<8x256xf32>
      %21 = tpu.matmul %18, %20, %cst_14 {dimension_numbers = #tpu.dot_dimension_numbers<[1], [0], [0], [1], [0, 0, 1, 1], [], []>} : vector<8x512xbf16>, vector<512x256xbf16>, vector<8x256xf32> -> vector<8x256xf32>
      %c0_15 = arith.constant 0 : index
      %c0_16 = arith.constant 0 : index
      %c0_17 = arith.constant 0 : index
      %22 = vector.load %arg5[%c0_15, %c0_16, %c0_17] : memref<1x1x256xf32, #tpu.memory_space<vmem>>, vector<1x1x256xf32>
      %23 = vector.shape_cast %22 : vector<1x1x256xf32> to vector<1x256xf32>
      %24 = vector.broadcast %23 : vector<1x256xf32> to vector<8x256xf32>
      %25 = arith.addf %21, %24 : vector<8x256xf32>
      %26 = vector.extract_strided_slice %25 {offsets = [0, 0], sizes = [8, 128], strides = [1, 1]} : vector<8x256xf32> to vector<8x128xf32>
      %27 = vector.extract_strided_slice %25 {offsets = [0, 128], sizes = [8, 128], strides = [1, 1]} : vector<8x256xf32> to vector<8x128xf32>
      %28 = math.exp %27 : vector<8x128xf32>
      %29 = arith.mulf %7, %28 : vector<8x128xf32>
      %30 = arith.addf %29, %26 : vector<8x128xf32>
      %c0_18 = arith.constant 0 : index
      %c0_19 = arith.constant 0 : index
      %31 = vector.load %arg6[%c0_18, %c0_19] : memref<8x256xf32, #tpu.memory_space<vmem>>, vector<8x128xf32>
      tpu.vector_store %arg6[%c0_18, %c0_19], %30 {strides = array<i32>} : memref<8x256xf32, #tpu.memory_space<vmem>>, vector<8x128xf32>,
    } else {
    }
    return
  }
  func.func @transform_0(%arg0: i32) -> (i32, i32) {
    %c0_i32 = arith.constant 0 : i32
    %c0_i32_0 = arith.constant 0 : i32
    %c0_i32_1 = arith.constant 0 : i32
    return %c0_i32, %c0_i32_0 : i32, i32
  }
  func.func @transform_1(%arg0: i32) -> (i32, i32, i32) {
    %c2_i32 = arith.constant 2 : i32
    %0 = arith.addi %c2_i32, %arg0 : i32
    %c0_i32 = arith.constant 0 : i32
    %c0_i32_0 = arith.constant 0 : i32
    %c0_i32_1 = arith.constant 0 : i32
    return %0, %c0_i32, %c0_i32_0 : i32, i32, i32
  }
  func.func @transform_2(%arg0: i32) -> (i32, i32, i32) {
    %c2_i32 = arith.constant 2 : i32
    %0 = arith.addi %c2_i32, %arg0 : i32
    %c0_i32 = arith.constant 0 : i32
    %c0_i32_0 = arith.constant 0 : i32
    %c0_i32_1 = arith.constant 0 : i32
    return %0, %c0_i32, %c0_i32_0 : i32, i32, i32
  }
  func.func @transform_3(%arg0: i32) -> (i32, i32, i32) {
    %c2_i32 = arith.constant 2 : i32
    %0 = arith.addi %c2_i32, %arg0 : i32
    %c0_i32 = arith.constant 0 : i32
    %c0_i32_0 = arith.constant 0 : i32
    %c0_i32_1 = arith.constant 0 : i32
    return %0, %c0_i32, %c0_i32_0 : i32, i32, i32
  }
  func.func @transform_4(%arg0: i32) -> (i32, i32, i32) {
    %c2_i32 = arith.constant 2 : i32
    %0 = arith.addi %c2_i32, %arg0 : i32
    %c0_i32 = arith.constant 0 : i32
    %c0_i32_0 = arith.constant 0 : i32
    %c0_i32_1 = arith.constant 0 : i32
    return %0, %c0_i32, %c0_i32_0 : i32, i32, i32
  }
  func.func @transform_5(%arg0: i32) -> (i32, i32) {
    %c0_i32 = arith.constant 0 : i32
    %c0_i32_0 = arith.constant 0 : i32
    %c0_i32_1 = arith.constant 0 : i32
    return %c0_i32, %c0_i32_0 : i32, i32
  }
}

</mosaic_0001>

<bundles_post_ra>
// kernel: realnvp_forward.2
= control target key start
LH: loop header
LB: loop body
LE: loop exit
PB: predicated region body
PF: predicated region fallthrough
CT: control target
= control target key end

     0   :  { %10 = vsyncpa [#allocation3], 0  ;;  %s3058_s0 = inlined_call_operand.vmem [shape: f32[8,256], index: 0, kind: input, shape index: {}, may-alias: {0,5}]   ;;  %s3059_s1 = inlined_call_operand.hbm [shape: bf16[4,128,512], index: 1, kind: input, shape index: {}]   ;;  %s3060_s2 = inlined_call_operand.vmem [shape: f32[4,1,512], index: 2, kind: input, shape index: {}]   ;;  %s3061_s3 = inlined_call_operand.hbm [shape: bf16[4,512,256], index: 3, kind: input, shape index: {}]   ;;  %s3062_s4 = inlined_call_operand.vmem [shape: f32[4,1,256], index: 4, kind: input, shape index: {}]   ;;  %s3063_s5 = inlined_call_operand.vmem [shape: f32[8,256], index: 5, kind: output, shape index: {}, may-alias: {0,5}]  }
   0x1   :  { %12 = vsyncpa [#allocation3 + $0x1], 0 }
   0x2   :  { %13 = vsyncpa [#allocation5], 0 }
   0x3   :  { %15 = vsyncpa [#allocation5 + $0x1], 0  ;;  %s2672_s18 = smov 0   ;;  %s2674_s19 = smov 0  }
   0x4   :  { %s2676_s20 = smov 0   ;;  %s2678_s21 = smov 0  }
   0x5 LB: > { %s2691_s22 = sadd.s32 4294967295, %s2632_s21   ;;  %s2694_s23 = sadd.s32 1, %s2632_s21   ;;  %s2632_s21 = sphi %s2678_s21, %s3073_s21   ;;  %s2628_s20 = sphi %s2676_s20, %s3072_s20   ;;  %s2624_s19 = sphi %s2674_s19, %s3071_s19   ;;  %s2620_s18 = sphi %s2672_s18, %s3070_s18  }
   0x6   : > { %s46_s24 = ssub.s32 %s2632_s21, %s2694_s23  ;;  %s49_s25 = sadd.s32 1, %s2628_s20 }
   0x7   : > { %p47_p0 = scmp.eq.s32.totalorder %s46_s24, 0  ;;  %p56_p1 = scmp.ne.s32.totalorder %s2628_s20, %s2624_s19 }
   0x8   : > { %p57_p2 = scmp.eq.s32.totalorder %s2632_s21, 0  ;;  %p62_p3 = scmp.ne.s32.totalorder %s2624_s19, %s2620_s18 }
   0x9   : > { %s2704_s26 = scalar_select %p47_p0, %s2628_s20, %s49_s25  }
   0xa   : > { %p58_p4 = por %p57_p2, %p56_p1  ;;  %p63_p5 = scmp.eq.s32.totalorder %s2691_s22, 0 }
   0xb   : > { %p2203_p6 = scmp.lt.s32.totalorder %s2632_s21, 2  ;;  %s2713_s28 = sand.u32 1, %s2628_s20  }
   0xc   : > { %p2708_p7 = por %p63_p5, %p62_p3  ;;  %s1983_s29 = sshll.u32 %s2713_s28, 8 }
   0xd   : > { %s2190_s30 = sshll.u32 %s2632_s21, 12  ;;  %s192_s9 = scalar_lea.vmem [#allocation2], %s1983_s29 }
   0xe   : > { %s3065_s27 = scalar_select %p2708_p7, 1, 0 }
   0xf   : > { %s2720_s8 = scalar_lea.hbm %s3059_s1, %s2190_s30  ;;  %s199_s10 = sshll.u32 %s192_s9, 4  ;;  %s2722_s10 = int_to_ptr.vmem [resolvable:$true] %s199_s10 }
  0x10   : > { %p2724_p8 = pnand %p2203_p6, %p58_p4  ;;  %s189_s12 = scalar_lea.sflag [#allocation3], %s2713_s28 }
  0x11   : > { %s2534_s13 = scalar_lea.hbm %s2720_s8, 4096  ;;  %s2539_s16 = scalar_lea.hbm %s3059_s1, 16384 }
  0x12   : > { %p2535_p10 = scmp.ne.s32.totalorder %s2720_s8, %s2534_s13  ;;  %p2536_p11 = pneg %p2724_p8 }
  0x13   : > { %p2540_p0 = scmp.lt.u32.totalorder %s2720_s8, %s3059_s1  ;;  %p2541_p1 = scmp.lt.u32.totalorder %s2539_s16, %s2534_s13 }
  0x14   : > { %p2537_p12 = pnand %p2536_p11, %p2535_p10  ;;  %p2543_p3 = scmp.lt.u32.totalorder %s2534_s13, %s2720_s8 }
  0x15   : > { %p2542_p2 = por %p2541_p1, %p2540_p0 }
  0x16   : > { %p2538_p13 = pneg %p2537_p12 }
  0x17   : > { %p2544_p4 = por %p2543_p3, %p2542_p2 }
  0x19   : > { %p2545_p5 = pnand %p2544_p4, %p2538_p13 }
  0x1b   : > { %2548 = shalt.err (!%p2545_p5)
}
  0x1c   : > { %s2549_s24 = scalar_lea.vmem %s2722_s10, 4096  ;;  %s2634_s25 = smov [#allocation2]  }
  0x1d   : > { %p2550_p6 = scmp.ne.s32.totalorder %s2722_s10, %s2549_s24  ;;  %s2554_s29 = sshll.u32 %s2634_s25, 4  ;;  %s2555_s29 = int_to_ptr.vmem [resolvable:$false] %s2554_s29 }
  0x1e   : > { %s2556_s30 = scalar_lea.vmem %s2555_s29, 8192  ;;  %p2557_p9 = scmp.lt.s32.totalorder %s2722_s10, %s2555_s29 }
  0x1f   : > { %p2552_p10 = pnand %p2550_p6, %p2536_p11  ;;  %p2558_p0 = scmp.lt.s32.totalorder %s2556_s30, %s2549_s24 }
  0x21   : > { %p2553_p12 = pneg %p2552_p10  ;;  %p2559_p1 = por %p2558_p0, %p2557_p9 }
  0x23   : > { %p2560_p2 = pnand %p2559_p1, %p2553_p12 }
  0x25   : > { %2563 = shalt.err (!%p2560_p2)
}
  0x26   : > { %s2635_s6 = smov 256   ;;  %s2636_s7 = smov 16  }
  0x27   : > { %2199 = dma.hbm_to_vmem [thread:$0]  (!%p2724_p8), %s2720_s8, 4096, %s2722_s10, %s189_s12, %s2635_s6, %s2635_s6, %s2636_s7  }
  0x28   : > { %p242_p13 = scmp.lt.s32.totalorder %s2632_s21, 3  ;;  %s1986_s9 = sshll.u32 %s2713_s28, 9 }
  0x29   : > { %s2191_s13 = sshll.u32 %s2632_s21, 13  ;;  %p3067_p9 = scmp.ge.s32.totalorder %s2632_s21, 1 }
  0x2a   : > { %s2769_s17 = scalar_lea.hbm %s3061_s3, %s2191_s13  ;;  %s220_s18 = scalar_lea.vmem [#allocation4], %s1986_s9 }
  0x2b   : > { %p2762_p3 = pnand %p3067_p9, %p242_p13  ;;  %s227_s24 = sshll.u32 %s220_s18, 4  ;;  %s2771_s24 = int_to_ptr.vmem [resolvable:$true] %s227_s24 }
  0x2c   : > { %s217_s8 = scalar_lea.sflag [#allocation5], %s2713_s28  ;;  %s2564_s10 = scalar_lea.hbm %s2769_s17, 8192 }
  0x2d   : > { %p2565_p4 = scmp.ne.s32.totalorder %s2769_s17, %s2564_s10  ;;  %s2569_s25 = scalar_lea.hbm %s3061_s3, 32768 }
  0x2e   : > { %p2570_p10 = scmp.lt.u32.totalorder %s2769_s17, %s3061_s3  ;;  %p2571_p12 = scmp.lt.u32.totalorder %s2569_s25, %s2564_s10 }
  0x2f   : > { %p2567_p5 = pnand %p2565_p4, %p2536_p11  ;;  %p2573_p1 = scmp.lt.u32.totalorder %s2564_s10, %s2769_s17 }
  0x30   : > { %p2572_p0 = por %p2571_p12, %p2570_p10 }
  0x31   : > { %p2568_p6 = pneg %p2567_p5 }
  0x32   : > { %p2574_p2 = por %p2573_p1, %p2572_p0 }
  0x34   : > { %p2575_p13 = pnand %p2574_p2, %p2568_p6 }
  0x36   : > { %2578 = shalt.err (!%p2575_p13)
}
  0x37   : > { %s2579_s6 = scalar_lea.vmem %s2771_s24, 8192  ;;  %s2637_s7 = smov [#allocation4]  }
  0x38   : > { %p2580_p9 = scmp.ne.s32.totalorder %s2771_s24, %s2579_s6  ;;  %s2584_s9 = sshll.u32 %s2637_s7, 4  ;;  %s2585_s9 = int_to_ptr.vmem [resolvable:$false] %s2584_s9 }
  0x39   : > { %s2586_s13 = scalar_lea.vmem %s2585_s9, 16384  ;;  %p2587_p7 = scmp.lt.s32.totalorder %s2771_s24, %s2585_s9 }
  0x3a   : > { %p2582_p4 = pnand %p2580_p9, %p2536_p11  ;;  %p2588_p10 = scmp.lt.s32.totalorder %s2586_s13, %s2579_s6 }
  0x3c   : > { %p2583_p5 = pneg %p2582_p4  ;;  %p2589_p12 = por %p2588_p10, %p2587_p7 }
  0x3e   : > { %p2590_p0 = pnand %p2589_p12, %p2583_p5 }
  0x40   : > { %2593 = shalt.err (!%p2590_p0)
}
  0x41   : > { %s2638_s15 = smov 128   ;;  %s2639_s16 = smov 8  }
  0x42   : > { %2202 = dma.hbm_to_vmem [thread:$0]  (!%p2724_p8), %s2769_s17, 8192, %s2771_s24, %s217_s8, %s2638_s15, %s2638_s15, %s2639_s16  }
  0x43   : > { %246 = sbr.rel (%p2762_p3) target bundleno = 1059 (0x423), region = 40  ;;  %s248_s18 = sand.u32 (!%p2762_p3), 1, %s2624_s19  }
  0x44   : > { %s1990_s10 = sshll.u32 (!%p2762_p3), %s248_s18, 8  ;;  %s249_s21 = scalar_lea.sflag (!%p2762_p3), [#allocation3], %s248_s18 }
  0x45   : > { %s2802_s12 = scalar_lea.vmem (!%p2762_p3), [#allocation2], %s1990_s10  ;;  %p3069_p7 = scmp.ne.s32.totalorder (!%p2762_p3), %s3065_s27, 0 }
  0x4a   : > { %2611 = dma.done.wait (%p3069_p7), %s249_s21, 4096  }
  0x4b   : > { %2613 = vsyncadd (%p3069_p7), %s249_s21, 4294963200  ;;  %s1991_s25 = sshll.u32 %s248_s18, 9  ;;  %s258_s11 = scalar_lea.sflag [#allocation5], %s248_s18 }
  0x4c   : > { %s2808_s28 = scalar_lea.vmem [#allocation4], %s1991_s25 }
  0x4d   : > { %2615 = dma.done.wait (%p3069_p7), %s258_s11, 8192  }
  0x4e   : > { %2617 = vsyncadd (%p3069_p7), %s258_s11, 4294959104  ;;  %p296_p8 = scmp.lt.s32.totalorder %s2691_s22, 3  ;;  %p1994_p11 = scmp.ne.s32.totalorder %s2691_s22, 0 }
  0x4f   : > { %v2242_v0 = vld [vmem:[%s2802_s12 + $0x4] ss:$16 sps:$4 sm:$0xff] (!%p1994_p11)   ;;  %v2244_v1 = vld [vmem:[%s2802_s12 + $0xc] ss:$16 sps:$4 sm:$0xff] (!%p1994_p11)   ;;  %v2640_v2 = vmov (!%p1994_p11), 0  }
  0x50   : > { %s297_s14 = scalar_select %p296_p8, %s2691_s22, 3 }
  0x51   : > { %308 = sbr.rel (%p1994_p11) target bundleno = 569 (0x239), region = 52  ;;  %559 = vmatprep.mubr.bf16.mxu0 (!%p1994_p11), %v2640_v2  ;;  %600 = vmatprep.mubr.bf16.mxu1 (!%p1994_p11), %v2640_v2  ;;  %v2246_v3 = vld [vmem:[%s2802_s12] ss:$16 sps:$4 sm:$0xff] (!%p1994_p11)   ;;  %v2247_v4 = vld [vmem:[%s2802_s12 + $0x8] ss:$16 sps:$4 sm:$0xff] (!%p1994_p11)  }
  0x52   : > { %s1992_s17 = sshll.u32 %s297_s14, 2  ;;  %s1993_s24 = sshll.u32 %s297_s14, 1  ;;  %527 = vmatprep.subr.bf16.mxu0 (!%p1994_p11), %v2242_v0  ;;  %568 = vmatprep.subr.bf16.mxu1 (!%p1994_p11), %v2244_v1  ;;  %v2248_v5 = vld [vmem:[%s2802_s12 + $0x24] ss:$16 sps:$4 sm:$0xff] (!%p1994_p11)   ;;  %v2250_v6 = vld [vmem:[%s2802_s12 + $0x2c] ss:$16 sps:$4 sm:$0xff] (!%p1994_p11)  }
  0x53   : > { %s2819_s30 = scalar_lea.vmem %s3060_s2, %s1992_s17  ;;  %s2824_s9 = scalar_lea.vmem %s3062_s4, %s1993_s24  ;;  %528 = vmatpush1.bf16.msra.mxu0 (!%p1994_p11), %v2246_v3  ;;  %569 = vmatpush1.bf16.msra.mxu1 (!%p1994_p11), %v2247_v4  ;;  %v2252_v7 = vld [vmem:[%s2802_s12 + $0x20] ss:$16 sps:$4 sm:$0xff] (!%p1994_p11)   ;;  %v2253_v8 = vld [vmem:[%s2802_s12 + $0x28] ss:$16 sps:$4 sm:$0xff] (!%p1994_p11)   ;;  %v2254_v9 = vld [vmem:[%s2802_s12 + $0x44] ss:$16 sps:$4 sm:$0xff] (!%p1994_p11)  }
  0x54   : > { %529 = vmatprep.subr.bf16.mxu0 (!%p1994_p11), %v2248_v5  ;;  %570 = vmatprep.subr.bf16.mxu1 (!%p1994_p11), %v2250_v6  ;;  %v2256_v10 = vld [vmem:[%s2802_s12 + $0x4c] ss:$16 sps:$4 sm:$0xff] (!%p1994_p11)   ;;  %v2258_v11 = vld [vmem:[%s2802_s12 + $0x40] ss:$16 sps:$4 sm:$0xff] (!%p1994_p11)   ;;  %v2259_v12 = vld [vmem:[%s2802_s12 + $0x48] ss:$16 sps:$4 sm:$0xff] (!%p1994_p11)  }
  0x55   : > { %v2260_v13 = vld [vmem:[%s2802_s12 + $0x64] ss:$16 sps:$4 sm:$0xff] (!%p1994_p11)   ;;  %v2262_v14 = vld [vmem:[%s2802_s12 + $0x6c] ss:$16 sps:$4 sm:$0xff] (!%p1994_p11)   ;;  %v2264_v15 = vld [vmem:[%s2802_s12 + $0x60] ss:$16 sps:$4 sm:$0xff] (!%p1994_p11)  }
  0x56   : > { %v2265_v16 = vld [vmem:[%s2802_s12 + $0x68] ss:$16 sps:$4 sm:$0xff] (!%p1994_p11)   ;;  %v2266_v17 = vld [vmem:[%s2802_s12 + $0x84] ss:$16 sps:$4 sm:$0xff] (!%p1994_p11)   ;;  %v2268_v18 = vld [vmem:[%s2802_s12 + $0x8c] ss:$16 sps:$4 sm:$0xff] (!%p1994_p11)  }
  0x57   : > { %530 = vmatpush1.bf16.msra.mxu0 (!%p1994_p11), %v2252_v7  ;;  %571 = vmatpush1.bf16.msra.mxu1 (!%p1994_p11), %v2253_v8  ;;  %v2270_v19 = vld [vmem:[%s2802_s12 + $0x80] ss:$16 sps:$4 sm:$0xff] (!%p1994_p11)   ;;  %v2271_v20 = vld [vmem:[%s2802_s12 + $0x88] ss:$16 sps:$4 sm:$0xff] (!%p1994_p11)   ;;  %v2272_v21 = vld [vmem:[%s2802_s12 + $0xa4] ss:$16 sps:$4 sm:$0xff] (!%p1994_p11)  }
  0x58   : > { %531 = vmatprep.subr.bf16.mxu0 %v2254_v9  ;;  %572 = vmatprep.subr.bf16.mxu1 %v2256_v10  ;;  %v2274_v22 = vld [vmem:[%s2802_s12 + $0xac] ss:$16 sps:$4 sm:$0xff]   ;;  %v2276_v23 = vld [vmem:[%s2802_s12 + $0xa0] ss:$16 sps:$4 sm:$0xff]   ;;  %v2277_v24 = vld [vmem:[%s2802_s12 + $0xa8] ss:$16 sps:$4 sm:$0xff]  }
  0x59   : > { %v2278_v25 = vld [vmem:[%s2802_s12 + $0xc4] ss:$16 sps:$4 sm:$0xff]   ;;  %v2280_v26 = vld [vmem:[%s2802_s12 + $0xcc] ss:$16 sps:$4 sm:$0xff]   ;;  %v2282_v28 = vld [vmem:[%s2802_s12 + $0xc0] ss:$16 sps:$4 sm:$0xff]  }
  0x5a   : > { %v309_v27 = vld [vmem:[%s3058_s0] sm:$0xff]  ;;  %v2283_v29 = vld [vmem:[%s2802_s12 + $0xc8] ss:$16 sps:$4 sm:$0xff]   ;;  %v2286_v31 = vld [vmem:[%s2802_s12 + $0xec] ss:$16 sps:$4 sm:$0xff]  }
  0x5b   : > { %532 = vmatpush1.bf16.msra.mxu0 %v2258_v11  ;;  %573 = vmatpush1.bf16.msra.mxu1 %v2259_v12  ;;  %310 = vst [vmem:[%s3063_s5] sm:$0xff] %v309_v27  ;;  %v2284_v30 = vld [vmem:[%s2802_s12 + $0xe4] ss:$16 sps:$4 sm:$0xff]   ;;  %v2288_v32 = vld [vmem:[%s2802_s12 + $0xe0] ss:$16 sps:$4 sm:$0xff]   ;;  %v2289_v33 = vld [vmem:[%s2802_s12 + $0xe8] ss:$16 sps:$4 sm:$0xff]   ;;  %v312_v36 = vpack.c.bf16 %v309_v27, %v309_v27 }
  0x5c   : > { %533 = vmatprep.subr.bf16.mxu0 %v2260_v13  ;;  %574 = vmatprep.subr.bf16.mxu1 %v2262_v14  ;;  %v2292_v34 = vld [vmem:[%s2808_s28 + $0x4] ss:$8 sps:$4 sm:$0xff]   ;;  %v2290_v37 = vld [vmem:[%s2808_s28] ss:$8 sps:$4 sm:$0xff]   ;;  %v2298_v39 = vld [vmem:[%s2808_s28 + $0x14] ss:$8 sps:$4 sm:$0xff]  }
  0x5d   : > { %v2295_v35 = vld [vmem:[%s2808_s28 + $0x104] ss:$8 sps:$4 sm:$0xff]   ;;  %v2293_v38 = vld [vmem:[%s2808_s28 + $0x100] ss:$8 sps:$4 sm:$0xff]   ;;  %v2301_v40 = vld [vmem:[%s2808_s28 + $0x114] ss:$8 sps:$4 sm:$0xff]  }
  0x5e   : > { %v2296_v41 = vld [vmem:[%s2808_s28 + $0x10] ss:$8 sps:$4 sm:$0xff]   ;;  %v2304_v43 = vld [vmem:[%s2808_s28 + $0x24] ss:$8 sps:$4 sm:$0xff]   ;;  %v2302_v45 = vld [vmem:[%s2808_s28 + $0x20] ss:$8 sps:$4 sm:$0xff]  }
  0x5f   : > { %534 = vmatpush1.bf16.msra.mxu0 %v2264_v15  ;;  %575 = vmatpush1.bf16.msra.mxu1 %v2265_v16  ;;  %v2299_v42 = vld [vmem:[%s2808_s28 + $0x110] ss:$8 sps:$4 sm:$0xff]   ;;  %v2307_v44 = vld [vmem:[%s2808_s28 + $0x124] ss:$8 sps:$4 sm:$0xff]   ;;  %v2305_v46 = vld [vmem:[%s2808_s28 + $0x120] ss:$8 sps:$4 sm:$0xff]  }
  0x60   : > { %535 = vmatprep.subr.bf16.mxu0 %v2266_v17  ;;  %576 = vmatprep.subr.bf16.mxu1 %v2268_v18  ;;  %v2310_v47 = vld [vmem:[%s2808_s28 + $0x34] ss:$8 sps:$4 sm:$0xff]   ;;  %v2308_v49 = vld [vmem:[%s2808_s28 + $0x30] ss:$8 sps:$4 sm:$0xff]   ;;  %v2316_v51 = vld [vmem:[%s2808_s28 + $0x44] ss:$8 sps:$4 sm:$0xff]  }
  0x61   : > { %v2313_v48 = vld [vmem:[%s2808_s28 + $0x134] ss:$8 sps:$4 sm:$0xff]   ;;  %v2311_v50 = vld [vmem:[%s2808_s28 + $0x130] ss:$8 sps:$4 sm:$0xff]   ;;  %v2319_v52 = vld [vmem:[%s2808_s28 + $0x144] ss:$8 sps:$4 sm:$0xff]  }
  0x62   : > { %v2314_v53 = vld [vmem:[%s2808_s28 + $0x40] ss:$8 sps:$4 sm:$0xff]   ;;  %v2322_v55 = vld [vmem:[%s2808_s28 + $0x54] ss:$8 sps:$4 sm:$0xff]   ;;  %v2320_v57 = vld [vmem:[%s2808_s28 + $0x50] ss:$8 sps:$4 sm:$0xff]  }
  0x63   : > { %536 = vmatpush1.bf16.msra.mxu0 %v2270_v19  ;;  %577 = vmatpush1.bf16.msra.mxu1 %v2271_v20  ;;  %v2317_v54 = vld [vmem:[%s2808_s28 + $0x140] ss:$8 sps:$4 sm:$0xff]   ;;  %v2325_v56 = vld [vmem:[%s2808_s28 + $0x154] ss:$8 sps:$4 sm:$0xff]   ;;  %v2323_v58 = vld [vmem:[%s2808_s28 + $0x150] ss:$8 sps:$4 sm:$0xff]  }
  0x64   : > { %537 = vmatprep.subr.bf16.mxu0 %v2272_v21  ;;  %578 = vmatprep.subr.bf16.mxu1 %v2274_v22  ;;  %v2328_v59 = vld [vmem:[%s2808_s28 + $0x64] ss:$8 sps:$4 sm:$0xff]   ;;  %v2326_v61 = vld [vmem:[%s2808_s28 + $0x60] ss:$8 sps:$4 sm:$0xff]   ;;  %v2334_v63 = vld [vmem:[%s2808_s28 + $0x74] ss:$8 sps:$4 sm:$0xff]  }
  0x65   : > { %v2331_v60 = vld [vmem:[%s2808_s28 + $0x164] ss:$8 sps:$4 sm:$0xff]   ;;  %v2329_v62 = vld [vmem:[%s2808_s28 + $0x160] ss:$8 sps:$4 sm:$0xff]   ;;  %v2337_v0 = vld [vmem:[%s2808_s28 + $0x174] ss:$8 sps:$4 sm:$0xff]  }
  0x66   : > { %v2332_v1 = vld [vmem:[%s2808_s28 + $0x70] ss:$8 sps:$4 sm:$0xff]   ;;  %v2340_v3 = vld [vmem:[%s2808_s28 + $0x84] ss:$8 sps:$4 sm:$0xff]   ;;  %v2338_v5 = vld [vmem:[%s2808_s28 + $0x80] ss:$8 sps:$4 sm:$0xff]  }
  0x67   : > { %538 = vmatpush1.bf16.msra.mxu0 %v2276_v23  ;;  %579 = vmatpush1.bf16.msra.mxu1 %v2277_v24  ;;  %v2335_v2 = vld [vmem:[%s2808_s28 + $0x170] ss:$8 sps:$4 sm:$0xff]   ;;  %v2343_v4 = vld [vmem:[%s2808_s28 + $0x184] ss:$8 sps:$4 sm:$0xff]   ;;  %v2341_v6 = vld [vmem:[%s2808_s28 + $0x180] ss:$8 sps:$4 sm:$0xff]  }
  0x68   : > { %539 = vmatprep.subr.bf16.mxu0 %v2278_v25  ;;  %580 = vmatprep.subr.bf16.mxu1 %v2280_v26  ;;  %v2346_v7 = vld [vmem:[%s2808_s28 + $0x94] ss:$8 sps:$4 sm:$0xff]   ;;  %v2344_v9 = vld [vmem:[%s2808_s28 + $0x90] ss:$8 sps:$4 sm:$0xff]   ;;  %v2352_v11 = vld [vmem:[%s2808_s28 + $0xa4] ss:$8 sps:$4 sm:$0xff]  }
  0x69   : > { %v2349_v8 = vld [vmem:[%s2808_s28 + $0x194] ss:$8 sps:$4 sm:$0xff]   ;;  %v2347_v10 = vld [vmem:[%s2808_s28 + $0x190] ss:$8 sps:$4 sm:$0xff]   ;;  %v2355_v12 = vld [vmem:[%s2808_s28 + $0x1a4] ss:$8 sps:$4 sm:$0xff]  }
  0x6a   : > { %v2350_v13 = vld [vmem:[%s2808_s28 + $0xa0] ss:$8 sps:$4 sm:$0xff]   ;;  %v2358_v15 = vld [vmem:[%s2808_s28 + $0xb4] ss:$8 sps:$4 sm:$0xff]   ;;  %v2356_v17 = vld [vmem:[%s2808_s28 + $0xb0] ss:$8 sps:$4 sm:$0xff]  }
  0x6b   : > { %540 = vmatpush1.bf16.msra.mxu0 %v2282_v28  ;;  %581 = vmatpush1.bf16.msra.mxu1 %v2283_v29  ;;  %v2353_v14 = vld [vmem:[%s2808_s28 + $0x1a0] ss:$8 sps:$4 sm:$0xff]   ;;  %v2361_v16 = vld [vmem:[%s2808_s28 + $0x1b4] ss:$8 sps:$4 sm:$0xff]   ;;  %v2359_v18 = vld [vmem:[%s2808_s28 + $0x1b0] ss:$8 sps:$4 sm:$0xff]  }
  0x6c   : > { %541 = vmatprep.subr.bf16.mxu0 %v2284_v30  ;;  %582 = vmatprep.subr.bf16.mxu1 %v2286_v31  ;;  %v2364_v19 = vld [vmem:[%s2808_s28 + $0xc4] ss:$8 sps:$4 sm:$0xff]   ;;  %v2362_v21 = vld [vmem:[%s2808_s28 + $0xc0] ss:$8 sps:$4 sm:$0xff]   ;;  %v2370_v23 = vld [vmem:[%s2808_s28 + $0xd4] ss:$8 sps:$4 sm:$0xff]  }
  0x6d   : > { %v2367_v20 = vld [vmem:[%s2808_s28 + $0x1c4] ss:$8 sps:$4 sm:$0xff]   ;;  %v2365_v22 = vld [vmem:[%s2808_s28 + $0x1c0] ss:$8 sps:$4 sm:$0xff]   ;;  %v2373_v24 = vld [vmem:[%s2808_s28 + $0x1d4] ss:$8 sps:$4 sm:$0xff]  }
  0x6e   : > { %v2368_v25 = vld [vmem:[%s2808_s28 + $0xd0] ss:$8 sps:$4 sm:$0xff]   ;;  %v2376_v27 = vld [vmem:[%s2808_s28 + $0xe4] ss:$8 sps:$4 sm:$0xff]   ;;  %v2374_v29 = vld [vmem:[%s2808_s28 + $0xe0] ss:$8 sps:$4 sm:$0xff]  }
  0x6f   : > { %542 = vmatpush1.bf16.msra.mxu0 %v2288_v32  ;;  %583 = vmatpush1.bf16.msra.mxu1 %v2289_v33  ;;  %v2371_v26 = vld [vmem:[%s2808_s28 + $0x1d0] ss:$8 sps:$4 sm:$0xff]   ;;  %v2379_v28 = vld [vmem:[%s2808_s28 + $0x1e4] ss:$8 sps:$4 sm:$0xff]   ;;  %v2377_v30 = vld [vmem:[%s2808_s28 + $0x1e0] ss:$8 sps:$4 sm:$0xff]  }
  0x70   : > { %1013 = vmatprep.subr.bf16.mxu0 %v2292_v34  ;;  %1054 = vmatprep.subr.bf16.mxu1 %v2295_v35  ;;  %v2382_v31 = vld [vmem:[%s2808_s28 + $0xf4] ss:$8 sps:$4 sm:$0xff]   ;;  %v2380_v33 = vld [vmem:[%s2808_s28 + $0xf0] ss:$8 sps:$4 sm:$0xff]   ;;  %v347_v35 = vlaneseq }
  0x71   : > { %v2385_v32 = vld [vmem:[%s2808_s28 + $0x1f4] ss:$8 sps:$4 sm:$0xff]   ;;  %v2383_v34 = vld [vmem:[%s2808_s28 + $0x1f0] ss:$8 sps:$4 sm:$0xff]  }
  0x72   : > { %560 = vmatmul.mubr.bf16.vlgmr.msra.gmra.mrb[0].mxu0 %v312_v36  ;;  %601 = vmatmul.mubr.bf16.vlgmr.msra.gmra.mrb[0].mxu1 %v312_v36  ;;  %v348_v36 = vshrl.u32 %v347_v35, 7 }
  0x73   : > { %1014 = vmatpush1.bf16.msra.mxu0 %v2290_v37  ;;  %1055 = vmatpush1.bf16.msra.mxu1 %v2293_v38 }
  0x74   : > { %1015 = vmatprep.subr.bf16.mxu0 %v2298_v39  ;;  %1056 = vmatprep.subr.bf16.mxu1 %v2301_v40  ;;  %v349_v37 = vsub.s32 0, %v348_v36  ;;  %v357_v38 = vsub.s32 2, %v348_v36  ;;  %v345_v39 = vld [vmem:[%s2819_s30] sm:$0xf]  ;;  %v353_v40 = vsub.s32 1, %v348_v36 }
  0x77   : > { %1016 = vmatpush1.bf16.msra.mxu0 %v2296_v41  ;;  %1057 = vmatpush1.bf16.msra.mxu1 %v2299_v42  ;;  %v361_v41 = vsub.s32 3, %v348_v36  ;;  %v350_v42 = vrot.slane %v345_v39, %v349_v37 }
  0x78   : > { %1017 = vmatprep.subr.bf16.mxu0 %v2304_v43  ;;  %1058 = vmatprep.subr.bf16.mxu1 %v2307_v44  ;;  %v358_v43 = vrot.slane %v345_v39, %v357_v38  ;;  %v354_v44 = vrot.slane %v345_v39, %v353_v40 }
  0x7b   : > { %1018 = vmatpush1.bf16.msra.mxu0 %v2302_v45  ;;  %1059 = vmatpush1.bf16.msra.mxu1 %v2305_v46  ;;  %v362_v45 = vrot.slane %v345_v39, %v361_v41 }
  0x7c   : > { %1019 = vmatprep.subr.bf16.mxu0 %v2310_v47  ;;  %1060 = vmatprep.subr.bf16.mxu1 %v2313_v48 }
  0x7f   : > { %1020 = vmatpush1.bf16.msra.mxu0 %v2308_v49  ;;  %1061 = vmatpush1.bf16.msra.mxu1 %v2311_v50 }
  0x80   : > { %1021 = vmatprep.subr.bf16.mxu0 %v2316_v51  ;;  %1062 = vmatprep.subr.bf16.mxu1 %v2319_v52 }
  0x83   : > { %1022 = vmatpush1.bf16.msra.mxu0 %v2314_v53  ;;  %1063 = vmatpush1.bf16.msra.mxu1 %v2317_v54 }
  0x84   : > { %1023 = vmatprep.subr.bf16.mxu0 %v2322_v55  ;;  %1064 = vmatprep.subr.bf16.mxu1 %v2325_v56 }
  0x87   : > { %1024 = vmatpush1.bf16.msra.mxu0 %v2320_v57  ;;  %1065 = vmatpush1.bf16.msra.mxu1 %v2323_v58 }
  0x88   : > { %1025 = vmatprep.subr.bf16.mxu0 %v2328_v59  ;;  %1066 = vmatprep.subr.bf16.mxu1 %v2331_v60 }
  0x8b   : > { %1026 = vmatpush1.bf16.msra.mxu0 %v2326_v61  ;;  %1067 = vmatpush1.bf16.msra.mxu1 %v2329_v62 }
  0x8c   : > { %1027 = vmatprep.subr.bf16.mxu0 %v2334_v63  ;;  %1068 = vmatprep.subr.bf16.mxu1 %v2337_v0 }
  0x8f   : > { %1028 = vmatpush1.bf16.msra.mxu0 %v2332_v1  ;;  %1069 = vmatpush1.bf16.msra.mxu1 %v2335_v2  ;;  %v681_v2 = vld [vmem:[%s2824_s9] sm:$0x3] }
  0x90   : > { %1029 = vmatprep.subr.bf16.mxu0 %v2340_v3  ;;  %1070 = vmatprep.subr.bf16.mxu1 %v2343_v4  ;;  %v686_v3 = vrot.slane %v681_v2, %v349_v37  ;;  %v690_v4 = vrot.slane %v681_v2, %v353_v40 }
  0x93   : > { %1030 = vmatpush1.bf16.msra.mxu0 %v2338_v5  ;;  %1071 = vmatpush1.bf16.msra.mxu1 %v2341_v6 }
  0x94   : > { %1031 = vmatprep.subr.bf16.mxu0 %v2346_v7  ;;  %1072 = vmatprep.subr.bf16.mxu1 %v2349_v8 }
  0x97   : > { %1032 = vmatpush1.bf16.msra.mxu0 %v2344_v9  ;;  %1073 = vmatpush1.bf16.msra.mxu1 %v2347_v10 }
  0x98   : > { %1033 = vmatprep.subr.bf16.mxu0 %v2352_v11  ;;  %1074 = vmatprep.subr.bf16.mxu1 %v2355_v12 }
  0x9b   : > { %1034 = vmatpush1.bf16.msra.mxu0 %v2350_v13  ;;  %1075 = vmatpush1.bf16.msra.mxu1 %v2353_v14 }
  0x9c   : > { %1035 = vmatprep.subr.bf16.mxu0 %v2358_v15  ;;  %1076 = vmatprep.subr.bf16.mxu1 %v2361_v16 }
  0x9f   : > { %1036 = vmatpush1.bf16.msra.mxu0 %v2356_v17  ;;  %1077 = vmatpush1.bf16.msra.mxu1 %v2359_v18  ;;  %v311_v18 = vld [vmem:[%s3058_s0 + $0x8] sm:$0xff] }
  0xa0   : > { %1037 = vmatprep.subr.bf16.mxu0 %v2364_v19  ;;  %1078 = vmatprep.subr.bf16.mxu1 %v2367_v20 }
  0xa3   : > { %1038 = vmatpush1.bf16.msra.mxu0 %v2362_v21  ;;  %1079 = vmatpush1.bf16.msra.mxu1 %v2365_v22 }
  0xa4   : > { %1039 = vmatprep.subr.bf16.mxu0 %v2370_v23  ;;  %1080 = vmatprep.subr.bf16.mxu1 %v2373_v24 }
  0xa7   : > { %1040 = vmatpush1.bf16.msra.mxu0 %v2368_v25  ;;  %1081 = vmatpush1.bf16.msra.mxu1 %v2371_v26 }
  0xa8   : > { %1041 = vmatprep.subr.bf16.mxu0 %v2376_v27  ;;  %1082 = vmatprep.subr.bf16.mxu1 %v2379_v28 }
  0xab   : > { %1042 = vmatpush1.bf16.msra.mxu0 %v2374_v29  ;;  %1083 = vmatpush1.bf16.msra.mxu1 %v2377_v30 }
  0xac   : > { %1043 = vmatprep.subr.bf16.mxu0 %v2382_v31  ;;  %1084 = vmatprep.subr.bf16.mxu1 %v2385_v32 }
  0xaf   : > { %1044 = vmatpush1.bf16.msra.mxu0 %v2380_v33  ;;  %1085 = vmatpush1.bf16.msra.mxu1 %v2383_v34 }
 0x145   : > { %v561_v46 = vpop.f32.mrb[0].mxu0  ;;  %v602_v47 = vpop.f32.mrb[0].mxu1 }
 0x146   : > { %v562_v48 = vadd.f32 %v561_v46, %v350_v42  ;;  %v603_v49 = vadd.f32 %v602_v47, %v358_v43  ;;  %v563_v50 = vpop.f32.mrb[1].mxu0  ;;  %v604_v51 = vpop.f32.mrb[1].mxu1 }
 0x147   : > { %v564_v52 = vadd.f32 %v563_v50, %v354_v44  ;;  %v605_v53 = vadd.f32 %v604_v51, %v362_v45  ;;  %v565_v54 = vpop.f32.mrb[2].mxu0  ;;  %v606_v55 = vpop.f32.mrb[2].mxu1 }
 0x148   : > { %v609_v56 = vmax.f32 %v562_v48, 0.0  ;;  %v611_v57 = vmax.f32 %v603_v49, 0.0  ;;  %v566_v58 = vpop.f32.mrb[3].mxu0  ;;  %v607_v59 = vpop.f32.mrb[3].mxu1 }
 0x149   : > { %v610_v60 = vmax.f32 %v564_v52, 0.0  ;;  %v612_v61 = vmax.f32 %v605_v53, 0.0 }
 0x14a   : > { %v615_v62 = vpack.c.bf16 %v611_v57, %v611_v57  ;;  %v613_v1 = vpack.c.bf16 %v609_v56, %v609_v56 }
 0x14b   : > { %v614_v63 = vpack.c.bf16 %v610_v60, %v610_v60  ;;  %v616_v0 = vpack.c.bf16 %v612_v61, %v612_v61 }
 0x14d   : > { %1045 = vmatprep.mubr.bf16.mxu0 %v614_v63  ;;  %1086 = vmatprep.mubr.bf16.mxu1 %v616_v0 }
 0x14e   : > { %1046 = vmatmul.mubr.bf16.vlgmr.msra.gmra.mrb[4].mxu0 %v613_v1  ;;  %1087 = vmatmul.mubr.bf16.vlgmr.msra.gmra.mrb[4].mxu1 %v615_v62 }
 0x221   : > { %v1047_v5 = vpop.f32.mrb[4].mxu0  ;;  %v1088_v6 = vpop.f32.mrb[4].mxu1 }
 0x222   : > { %v1048_v7 = vadd.f32 %v1047_v5, %v686_v3  ;;  %v1049_v8 = vpop.f32.mrb[5].mxu0  ;;  %v1090_v9 = vpop.f32.mrb[5].mxu1 }
 0x223   : > { %v1050_v10 = vadd.f32 %v1049_v8, %v690_v4  ;;  %v1051_v11 = vpop.f32.mrb[6].mxu0  ;;  %v1092_v12 = vpop.f32.mrb[6].mxu1 }
 0x224   : > { %v1089_v13 = vadd.f32 %v1088_v6, %v1048_v7  ;;  %v1052_v14 = vpop.f32.mrb[7].mxu0  ;;  %v1093_v15 = vpop.f32.mrb[7].mxu1 }
 0x225   : > { %v1091_v16 = vadd.f32 %v1090_v9, %v1050_v10 }
 0x227   : > { %v1095_v17 = vmul.f32 1.442695, %v1091_v16 }
 0x229   : > { %2386 = vpow2.f32 %v1095_v17 }
 0x233   : > { %v2387_v19 = vpop.eup %2386 }
 0x234   : > { %v1097_v20 = vmul.f32 %v2387_v19, %v311_v18 }
 0x236   : > { %v1098_v21 = vadd.f32 %v1097_v20, %v1089_v13 }
 0x238   : > { %1099 = vst [vmem:[%s3063_s5 + $0x8] sm:$0xff] %v1098_v21 }
 0x239 PF: > { %p2091_p3 = scmp.ne.s32.totalorder %s2691_s22, 1 }
 0x23a   : > { %v2388_v22 = vld [vmem:[%s2802_s12 + $0x4] ss:$16 sps:$4 sm:$0xff] (!%p2091_p3)   ;;  %v2390_v23 = vld [vmem:[%s2802_s12 + $0xc] ss:$16 sps:$4 sm:$0xff] (!%p2091_p3)   ;;  %v2641_v24 = vmov (!%p2091_p3), 0  }
 0x23b   : > { %1103 = sbr.rel (%p2091_p3) target bundleno = 1059 (0x423), region = 56  ;;  %1353 = vmatprep.mubr.bf16.mxu0 (!%p2091_p3), %v2641_v24  ;;  %1394 = vmatprep.mubr.bf16.mxu1 (!%p2091_p3), %v2641_v24  ;;  %v2392_v25 = vld [vmem:[%s2802_s12] ss:$16 sps:$4 sm:$0xff] (!%p2091_p3)   ;;  %v2393_v26 = vld [vmem:[%s2802_s12 + $0x8] ss:$16 sps:$4 sm:$0xff] (!%p2091_p3)  }
 0x23c   : > { %1321 = vmatprep.subr.bf16.mxu0 (!%p2091_p3), %v2388_v22  ;;  %1362 = vmatprep.subr.bf16.mxu1 (!%p2091_p3), %v2390_v23  ;;  %v2394_v27 = vld [vmem:[%s2802_s12 + $0x24] ss:$16 sps:$4 sm:$0xff] (!%p2091_p3)   ;;  %v2396_v28 = vld [vmem:[%s2802_s12 + $0x2c] ss:$16 sps:$4 sm:$0xff] (!%p2091_p3)   ;;  %v2398_v29 = vld [vmem:[%s2802_s12 + $0x20] ss:$16 sps:$4 sm:$0xff] (!%p2091_p3)  }
 0x23d   : > { %1322 = vmatpush1.bf16.msra.mxu0 (!%p2091_p3), %v2392_v25  ;;  %1363 = vmatpush1.bf16.msra.mxu1 (!%p2091_p3), %v2393_v26  ;;  %v2399_v30 = vld [vmem:[%s2802_s12 + $0x28] ss:$16 sps:$4 sm:$0xff] (!%p2091_p3)   ;;  %v2400_v31 = vld [vmem:[%s2802_s12 + $0x44] ss:$16 sps:$4 sm:$0xff] (!%p2091_p3)   ;;  %v2402_v32 = vld [vmem:[%s2802_s12 + $0x4c] ss:$16 sps:$4 sm:$0xff] (!%p2091_p3)  }
 0x23e   : > { %1323 = vmatprep.subr.bf16.mxu0 (!%p2091_p3), %v2394_v27  ;;  %1364 = vmatprep.subr.bf16.mxu1 (!%p2091_p3), %v2396_v28  ;;  %v2404_v33 = vld [vmem:[%s2802_s12 + $0x40] ss:$16 sps:$4 sm:$0xff] (!%p2091_p3)   ;;  %v2405_v34 = vld [vmem:[%s2802_s12 + $0x48] ss:$16 sps:$4 sm:$0xff] (!%p2091_p3)   ;;  %v2406_v35 = vld [vmem:[%s2802_s12 + $0x64] ss:$16 sps:$4 sm:$0xff] (!%p2091_p3)  }
 0x23f   : > { %v2408_v36 = vld [vmem:[%s2802_s12 + $0x6c] ss:$16 sps:$4 sm:$0xff] (!%p2091_p3)   ;;  %v2410_v37 = vld [vmem:[%s2802_s12 + $0x60] ss:$16 sps:$4 sm:$0xff] (!%p2091_p3)   ;;  %v2411_v38 = vld [vmem:[%s2802_s12 + $0x68] ss:$16 sps:$4 sm:$0xff] (!%p2091_p3)  }
 0x240   : > { %v2412_v39 = vld [vmem:[%s2802_s12 + $0x84] ss:$16 sps:$4 sm:$0xff] (!%p2091_p3)   ;;  %v2414_v40 = vld [vmem:[%s2802_s12 + $0x8c] ss:$16 sps:$4 sm:$0xff] (!%p2091_p3)   ;;  %v2416_v41 = vld [vmem:[%s2802_s12 + $0x80] ss:$16 sps:$4 sm:$0xff] (!%p2091_p3)  }
 0x241   : > { %1324 = vmatpush1.bf16.msra.mxu0 (!%p2091_p3), %v2398_v29  ;;  %1365 = vmatpush1.bf16.msra.mxu1 (!%p2091_p3), %v2399_v30  ;;  %v2417_v42 = vld [vmem:[%s2802_s12 + $0x88] ss:$16 sps:$4 sm:$0xff] (!%p2091_p3)   ;;  %v2418_v43 = vld [vmem:[%s2802_s12 + $0xa4] ss:$16 sps:$4 sm:$0xff] (!%p2091_p3)   ;;  %v2420_v44 = vld [vmem:[%s2802_s12 + $0xac] ss:$16 sps:$4 sm:$0xff] (!%p2091_p3)  }
 0x242   : > { %1325 = vmatprep.subr.bf16.mxu0 %v2400_v31  ;;  %1366 = vmatprep.subr.bf16.mxu1 %v2402_v32  ;;  %v2422_v45 = vld [vmem:[%s2802_s12 + $0xa0] ss:$16 sps:$4 sm:$0xff]   ;;  %v2423_v46 = vld [vmem:[%s2802_s12 + $0xa8] ss:$16 sps:$4 sm:$0xff]   ;;  %v2424_v47 = vld [vmem:[%s2802_s12 + $0xc4] ss:$16 sps:$4 sm:$0xff]  }
 0x243   : > { %v2426_v48 = vld [vmem:[%s2802_s12 + $0xcc] ss:$16 sps:$4 sm:$0xff]   ;;  %v2428_v49 = vld [vmem:[%s2802_s12 + $0xc0] ss:$16 sps:$4 sm:$0xff]   ;;  %v2429_v50 = vld [vmem:[%s2802_s12 + $0xc8] ss:$16 sps:$4 sm:$0xff]  }
 0x244   : > { %v2430_v51 = vld [vmem:[%s2802_s12 + $0xe4] ss:$16 sps:$4 sm:$0xff]   ;;  %v2432_v52 = vld [vmem:[%s2802_s12 + $0xec] ss:$16 sps:$4 sm:$0xff]   ;;  %v2434_v53 = vld [vmem:[%s2802_s12 + $0xe0] ss:$16 sps:$4 sm:$0xff]  }
 0x245   : > { %1326 = vmatpush1.bf16.msra.mxu0 %v2404_v33  ;;  %1367 = vmatpush1.bf16.msra.mxu1 %v2405_v34  ;;  %v2435_v54 = vld [vmem:[%s2802_s12 + $0xe8] ss:$16 sps:$4 sm:$0xff]   ;;  %v2438_v56 = vld [vmem:[%s2808_s28 + $0x4] ss:$8 sps:$4 sm:$0xff]   ;;  %v2444_v61 = vld [vmem:[%s2808_s28 + $0x14] ss:$8 sps:$4 sm:$0xff]  }
 0x246   : > { %1327 = vmatprep.subr.bf16.mxu0 %v2406_v35  ;;  %1368 = vmatprep.subr.bf16.mxu1 %v2408_v36  ;;  %v1104_v55 = vld [vmem:[%s3063_s5 + $0x8] sm:$0xff]  ;;  %v2447_v62 = vld [vmem:[%s2808_s28 + $0x114] ss:$8 sps:$4 sm:$0xff]   ;;  %v2442_v63 = vld [vmem:[%s2808_s28 + $0x10] ss:$8 sps:$4 sm:$0xff]  }
 0x247   : > { %v2441_v57 = vld [vmem:[%s2808_s28 + $0x104] ss:$8 sps:$4 sm:$0xff]   ;;  %v1106_v58 = vpack.c.bf16 %v1104_v55, %v1104_v55  ;;  %v2436_v59 = vld [vmem:[%s2808_s28] ss:$8 sps:$4 sm:$0xff]   ;;  %v2445_v0 = vld [vmem:[%s2808_s28 + $0x110] ss:$8 sps:$4 sm:$0xff]  }
 0x248   : > { %v2439_v60 = vld [vmem:[%s2808_s28 + $0x100] ss:$8 sps:$4 sm:$0xff]   ;;  %v2450_v1 = vld [vmem:[%s2808_s28 + $0x24] ss:$8 sps:$4 sm:$0xff]   ;;  %v2456_v5 = vld [vmem:[%s2808_s28 + $0x34] ss:$8 sps:$4 sm:$0xff]  }
 0x249   : > { %1328 = vmatpush1.bf16.msra.mxu0 %v2410_v37  ;;  %1369 = vmatpush1.bf16.msra.mxu1 %v2411_v38  ;;  %v2453_v2 = vld [vmem:[%s2808_s28 + $0x124] ss:$8 sps:$4 sm:$0xff]   ;;  %v2448_v3 = vld [vmem:[%s2808_s28 + $0x20] ss:$8 sps:$4 sm:$0xff]   ;;  %v2459_v6 = vld [vmem:[%s2808_s28 + $0x134] ss:$8 sps:$4 sm:$0xff]  }
 0x24a   : > { %1329 = vmatprep.subr.bf16.mxu0 %v2412_v39  ;;  %1370 = vmatprep.subr.bf16.mxu1 %v2414_v40  ;;  %v2451_v4 = vld [vmem:[%s2808_s28 + $0x120] ss:$8 sps:$4 sm:$0xff]   ;;  %v2454_v7 = vld [vmem:[%s2808_s28 + $0x30] ss:$8 sps:$4 sm:$0xff]   ;;  %v2462_v9 = vld [vmem:[%s2808_s28 + $0x44] ss:$8 sps:$4 sm:$0xff]  }
 0x24b   : > { %v2457_v8 = vld [vmem:[%s2808_s28 + $0x130] ss:$8 sps:$4 sm:$0xff]   ;;  %v2465_v10 = vld [vmem:[%s2808_s28 + $0x144] ss:$8 sps:$4 sm:$0xff]   ;;  %v2460_v11 = vld [vmem:[%s2808_s28 + $0x40] ss:$8 sps:$4 sm:$0xff]  }
 0x24c   : > { %v2463_v12 = vld [vmem:[%s2808_s28 + $0x140] ss:$8 sps:$4 sm:$0xff]   ;;  %v2468_v13 = vld [vmem:[%s2808_s28 + $0x54] ss:$8 sps:$4 sm:$0xff]   ;;  %v2466_v15 = vld [vmem:[%s2808_s28 + $0x50] ss:$8 sps:$4 sm:$0xff]  }
 0x24d   : > { %1330 = vmatpush1.bf16.msra.mxu0 %v2416_v41  ;;  %1371 = vmatpush1.bf16.msra.mxu1 %v2417_v42  ;;  %v2471_v14 = vld [vmem:[%s2808_s28 + $0x154] ss:$8 sps:$4 sm:$0xff]   ;;  %v2469_v16 = vld [vmem:[%s2808_s28 + $0x150] ss:$8 sps:$4 sm:$0xff]   ;;  %v2474_v17 = vld [vmem:[%s2808_s28 + $0x64] ss:$8 sps:$4 sm:$0xff]  }
 0x24e   : > { %1331 = vmatprep.subr.bf16.mxu0 %v2418_v43  ;;  %1372 = vmatprep.subr.bf16.mxu1 %v2420_v44  ;;  %v2477_v18 = vld [vmem:[%s2808_s28 + $0x164] ss:$8 sps:$4 sm:$0xff]   ;;  %v2472_v19 = vld [vmem:[%s2808_s28 + $0x60] ss:$8 sps:$4 sm:$0xff]   ;;  %v2480_v21 = vld [vmem:[%s2808_s28 + $0x74] ss:$8 sps:$4 sm:$0xff]  }
 0x24f   : > { %v2475_v20 = vld [vmem:[%s2808_s28 + $0x160] ss:$8 sps:$4 sm:$0xff]   ;;  %v2483_v22 = vld [vmem:[%s2808_s28 + $0x174] ss:$8 sps:$4 sm:$0xff]   ;;  %v2478_v23 = vld [vmem:[%s2808_s28 + $0x70] ss:$8 sps:$4 sm:$0xff]  }
 0x250   : > { %v2481_v24 = vld [vmem:[%s2808_s28 + $0x170] ss:$8 sps:$4 sm:$0xff]   ;;  %v2486_v25 = vld [vmem:[%s2808_s28 + $0x84] ss:$8 sps:$4 sm:$0xff]   ;;  %v2484_v27 = vld [vmem:[%s2808_s28 + $0x80] ss:$8 sps:$4 sm:$0xff]  }
 0x251   : > { %1332 = vmatpush1.bf16.msra.mxu0 %v2422_v45  ;;  %1373 = vmatpush1.bf16.msra.mxu1 %v2423_v46  ;;  %v2489_v26 = vld [vmem:[%s2808_s28 + $0x184] ss:$8 sps:$4 sm:$0xff]   ;;  %v2487_v28 = vld [vmem:[%s2808_s28 + $0x180] ss:$8 sps:$4 sm:$0xff]   ;;  %v2492_v29 = vld [vmem:[%s2808_s28 + $0x94] ss:$8 sps:$4 sm:$0xff]  }
 0x252   : > { %1333 = vmatprep.subr.bf16.mxu0 %v2424_v47  ;;  %1374 = vmatprep.subr.bf16.mxu1 %v2426_v48  ;;  %v2495_v30 = vld [vmem:[%s2808_s28 + $0x194] ss:$8 sps:$4 sm:$0xff]   ;;  %v2490_v31 = vld [vmem:[%s2808_s28 + $0x90] ss:$8 sps:$4 sm:$0xff]   ;;  %v2498_v33 = vld [vmem:[%s2808_s28 + $0xa4] ss:$8 sps:$4 sm:$0xff]  }
 0x253   : > { %v2493_v32 = vld [vmem:[%s2808_s28 + $0x190] ss:$8 sps:$4 sm:$0xff]   ;;  %v2501_v34 = vld [vmem:[%s2808_s28 + $0x1a4] ss:$8 sps:$4 sm:$0xff]   ;;  %v2496_v35 = vld [vmem:[%s2808_s28 + $0xa0] ss:$8 sps:$4 sm:$0xff]  }
 0x254   : > { %v2499_v36 = vld [vmem:[%s2808_s28 + $0x1a0] ss:$8 sps:$4 sm:$0xff]   ;;  %v2504_v37 = vld [vmem:[%s2808_s28 + $0xb4] ss:$8 sps:$4 sm:$0xff]   ;;  %v2502_v39 = vld [vmem:[%s2808_s28 + $0xb0] ss:$8 sps:$4 sm:$0xff]  }
 0x255   : > { %1334 = vmatpush1.bf16.msra.mxu0 %v2428_v49  ;;  %1375 = vmatpush1.bf16.msra.mxu1 %v2429_v50  ;;  %v2507_v38 = vld [vmem:[%s2808_s28 + $0x1b4] ss:$8 sps:$4 sm:$0xff]   ;;  %v2505_v40 = vld [vmem:[%s2808_s28 + $0x1b0] ss:$8 sps:$4 sm:$0xff]   ;;  %v2510_v41 = vld [vmem:[%s2808_s28 + $0xc4] ss:$8 sps:$4 sm:$0xff]  }
 0x256   : > { %1335 = vmatprep.subr.bf16.mxu0 %v2430_v51  ;;  %1376 = vmatprep.subr.bf16.mxu1 %v2432_v52  ;;  %v2513_v42 = vld [vmem:[%s2808_s28 + $0x1c4] ss:$8 sps:$4 sm:$0xff]   ;;  %v2508_v43 = vld [vmem:[%s2808_s28 + $0xc0] ss:$8 sps:$4 sm:$0xff]   ;;  %v2516_v45 = vld [vmem:[%s2808_s28 + $0xd4] ss:$8 sps:$4 sm:$0xff]  }
 0x257   : > { %v2511_v44 = vld [vmem:[%s2808_s28 + $0x1c0] ss:$8 sps:$4 sm:$0xff]   ;;  %v2519_v46 = vld [vmem:[%s2808_s28 + $0x1d4] ss:$8 sps:$4 sm:$0xff]   ;;  %v2514_v47 = vld [vmem:[%s2808_s28 + $0xd0] ss:$8 sps:$4 sm:$0xff]  }
 0x258   : > { %v2517_v48 = vld [vmem:[%s2808_s28 + $0x1d0] ss:$8 sps:$4 sm:$0xff]   ;;  %v2522_v49 = vld [vmem:[%s2808_s28 + $0xe4] ss:$8 sps:$4 sm:$0xff]   ;;  %v2520_v51 = vld [vmem:[%s2808_s28 + $0xe0] ss:$8 sps:$4 sm:$0xff]  }
 0x259   : > { %1336 = vmatpush1.bf16.msra.mxu0 %v2434_v53  ;;  %1377 = vmatpush1.bf16.msra.mxu1 %v2435_v54  ;;  %v2525_v50 = vld [vmem:[%s2808_s28 + $0x1e4] ss:$8 sps:$4 sm:$0xff]   ;;  %v2523_v52 = vld [vmem:[%s2808_s28 + $0x1e0] ss:$8 sps:$4 sm:$0xff]   ;;  %v2528_v53 = vld [vmem:[%s2808_s28 + $0xf4] ss:$8 sps:$4 sm:$0xff]  }
 0x25a   : > { %1807 = vmatprep.subr.bf16.mxu0 %v2438_v56  ;;  %1848 = vmatprep.subr.bf16.mxu1 %v2441_v57  ;;  %v2531_v54 = vld [vmem:[%s2808_s28 + $0x1f4] ss:$8 sps:$4 sm:$0xff]   ;;  %v2526_v55 = vld [vmem:[%s2808_s28 + $0xf0] ss:$8 sps:$4 sm:$0xff]   ;;  %v1141_v57 = vlaneseq }
 0x25b   : > { %v2529_v56 = vld [vmem:[%s2808_s28 + $0x1f0] ss:$8 sps:$4 sm:$0xff]  }
 0x25c   : > { %1354 = vmatmul.mubr.bf16.vlgmr.msra.gmra.mrb[0].mxu0 %v1106_v58  ;;  %1395 = vmatmul.mubr.bf16.vlgmr.msra.gmra.mrb[0].mxu1 %v1106_v58  ;;  %v1142_v58 = vshrl.u32 %v1141_v57, 7 }
 0x25d   : > { %1808 = vmatpush1.bf16.msra.mxu0 %v2436_v59  ;;  %1849 = vmatpush1.bf16.msra.mxu1 %v2439_v60 }
 0x25e   : > { %1809 = vmatprep.subr.bf16.mxu0 %v2444_v61  ;;  %1850 = vmatprep.subr.bf16.mxu1 %v2447_v62  ;;  %v1143_v59 = vsub.s32 0, %v1142_v58  ;;  %v1151_v60 = vsub.s32 2, %v1142_v58  ;;  %v1139_v61 = vld [vmem:[%s2819_s30] sm:$0xf]  ;;  %v1147_v62 = vsub.s32 1, %v1142_v58 }
 0x261   : > { %1810 = vmatpush1.bf16.msra.mxu0 %v2442_v63  ;;  %1851 = vmatpush1.bf16.msra.mxu1 %v2445_v0  ;;  %v1155_v63 = vsub.s32 3, %v1142_v58  ;;  %v1144_v0 = vrot.slane %v1139_v61, %v1143_v59 }
 0x262   : > { %1811 = vmatprep.subr.bf16.mxu0 %v2450_v1  ;;  %1852 = vmatprep.subr.bf16.mxu1 %v2453_v2  ;;  %v1152_v1 = vrot.slane %v1139_v61, %v1151_v60  ;;  %v1148_v2 = vrot.slane %v1139_v61, %v1147_v62 }
 0x265   : > { %1812 = vmatpush1.bf16.msra.mxu0 %v2448_v3  ;;  %1853 = vmatpush1.bf16.msra.mxu1 %v2451_v4  ;;  %v1156_v3 = vrot.slane %v1139_v61, %v1155_v63 }
 0x266   : > { %1813 = vmatprep.subr.bf16.mxu0 %v2456_v5  ;;  %1854 = vmatprep.subr.bf16.mxu1 %v2459_v6 }
 0x269   : > { %1814 = vmatpush1.bf16.msra.mxu0 %v2454_v7  ;;  %1855 = vmatpush1.bf16.msra.mxu1 %v2457_v8 }
 0x26a   : > { %1815 = vmatprep.subr.bf16.mxu0 %v2462_v9  ;;  %1856 = vmatprep.subr.bf16.mxu1 %v2465_v10 }
 0x26d   : > { %1816 = vmatpush1.bf16.msra.mxu0 %v2460_v11  ;;  %1857 = vmatpush1.bf16.msra.mxu1 %v2463_v12 }
 0x26e   : > { %1817 = vmatprep.subr.bf16.mxu0 %v2468_v13  ;;  %1858 = vmatprep.subr.bf16.mxu1 %v2471_v14 }
 0x271   : > { %1818 = vmatpush1.bf16.msra.mxu0 %v2466_v15  ;;  %1859 = vmatpush1.bf16.msra.mxu1 %v2469_v16 }
 0x272   : > { %1819 = vmatprep.subr.bf16.mxu0 %v2474_v17  ;;  %1860 = vmatprep.subr.bf16.mxu1 %v2477_v18 }
 0x275   : > { %1820 = vmatpush1.bf16.msra.mxu0 %v2472_v19  ;;  %1861 = vmatpush1.bf16.msra.mxu1 %v2475_v20 }
 0x276   : > { %1821 = vmatprep.subr.bf16.mxu0 %v2480_v21  ;;  %1862 = vmatprep.subr.bf16.mxu1 %v2483_v22 }
 0x279   : > { %1822 = vmatpush1.bf16.msra.mxu0 %v2478_v23  ;;  %1863 = vmatpush1.bf16.msra.mxu1 %v2481_v24  ;;  %v1475_v24 = vld [vmem:[%s2824_s9] sm:$0x3] }
 0x27a   : > { %1823 = vmatprep.subr.bf16.mxu0 %v2486_v25  ;;  %1864 = vmatprep.subr.bf16.mxu1 %v2489_v26  ;;  %v1480_v25 = vrot.slane %v1475_v24, %v1143_v59  ;;  %v1484_v26 = vrot.slane %v1475_v24, %v1147_v62 }
 0x27d   : > { %1824 = vmatpush1.bf16.msra.mxu0 %v2484_v27  ;;  %1865 = vmatpush1.bf16.msra.mxu1 %v2487_v28 }
 0x27e   : > { %1825 = vmatprep.subr.bf16.mxu0 %v2492_v29  ;;  %1866 = vmatprep.subr.bf16.mxu1 %v2495_v30 }
 0x281   : > { %1826 = vmatpush1.bf16.msra.mxu0 %v2490_v31  ;;  %1867 = vmatpush1.bf16.msra.mxu1 %v2493_v32 }
 0x282   : > { %1827 = vmatprep.subr.bf16.mxu0 %v2498_v33  ;;  %1868 = vmatprep.subr.bf16.mxu1 %v2501_v34 }
 0x285   : > { %1828 = vmatpush1.bf16.msra.mxu0 %v2496_v35  ;;  %1869 = vmatpush1.bf16.msra.mxu1 %v2499_v36 }
 0x286   : > { %1829 = vmatprep.subr.bf16.mxu0 %v2504_v37  ;;  %1870 = vmatprep.subr.bf16.mxu1 %v2507_v38 }
 0x289   : > { %1830 = vmatpush1.bf16.msra.mxu0 %v2502_v39  ;;  %1871 = vmatpush1.bf16.msra.mxu1 %v2505_v40  ;;  %v1105_v40 = vld [vmem:[%s3063_s5] sm:$0xff] }
 0x28a   : > { %1831 = vmatprep.subr.bf16.mxu0 %v2510_v41  ;;  %1872 = vmatprep.subr.bf16.mxu1 %v2513_v42 }
 0x28d   : > { %1832 = vmatpush1.bf16.msra.mxu0 %v2508_v43  ;;  %1873 = vmatpush1.bf16.msra.mxu1 %v2511_v44 }
 0x28e   : > { %1833 = vmatprep.subr.bf16.mxu0 %v2516_v45  ;;  %1874 = vmatprep.subr.bf16.mxu1 %v2519_v46 }
 0x291   : > { %1834 = vmatpush1.bf16.msra.mxu0 %v2514_v47  ;;  %1875 = vmatpush1.bf16.msra.mxu1 %v2517_v48 }
 0x292   : > { %1835 = vmatprep.subr.bf16.mxu0 %v2522_v49  ;;  %1876 = vmatprep.subr.bf16.mxu1 %v2525_v50 }
 0x295   : > { %1836 = vmatpush1.bf16.msra.mxu0 %v2520_v51  ;;  %1877 = vmatpush1.bf16.msra.mxu1 %v2523_v52 }
 0x296   : > { %1837 = vmatprep.subr.bf16.mxu0 %v2528_v53  ;;  %1878 = vmatprep.subr.bf16.mxu1 %v2531_v54 }
 0x299   : > { %1838 = vmatpush1.bf16.msra.mxu0 %v2526_v55  ;;  %1879 = vmatpush1.bf16.msra.mxu1 %v2529_v56 }
 0x32f   : > { %v1355_v4 = vpop.f32.mrb[0].mxu0  ;;  %v1396_v5 = vpop.f32.mrb[0].mxu1 }
 0x330   : > { %v1356_v6 = vadd.f32 %v1355_v4, %v1144_v0  ;;  %v1397_v7 = vadd.f32 %v1396_v5, %v1152_v1  ;;  %v1357_v8 = vpop.f32.mrb[1].mxu0  ;;  %v1398_v9 = vpop.f32.mrb[1].mxu1 }
 0x331   : > { %v1358_v10 = vadd.f32 %v1357_v8, %v1148_v2  ;;  %v1399_v11 = vadd.f32 %v1398_v9, %v1156_v3  ;;  %v1359_v12 = vpop.f32.mrb[2].mxu0  ;;  %v1400_v13 = vpop.f32.mrb[2].mxu1 }
 0x332   : > { %v1403_v14 = vmax.f32 %v1356_v6, 0.0  ;;  %v1405_v15 = vmax.f32 %v1397_v7, 0.0  ;;  %v1360_v16 = vpop.f32.mrb[3].mxu0  ;;  %v1401_v17 = vpop.f32.mrb[3].mxu1 }
 0x333   : > { %v1404_v18 = vmax.f32 %v1358_v10, 0.0  ;;  %v1406_v19 = vmax.f32 %v1399_v11, 0.0 }
 0x334   : > { %v1409_v20 = vpack.c.bf16 %v1405_v15, %v1405_v15  ;;  %v1407_v23 = vpack.c.bf16 %v1403_v14, %v1403_v14 }
 0x335   : > { %v1408_v21 = vpack.c.bf16 %v1404_v18, %v1404_v18  ;;  %v1410_v22 = vpack.c.bf16 %v1406_v19, %v1406_v19 }
 0x337   : > { %1839 = vmatprep.mubr.bf16.mxu0 %v1408_v21  ;;  %1880 = vmatprep.mubr.bf16.mxu1 %v1410_v22 }
 0x338   : > { %1840 = vmatmul.mubr.bf16.vlgmr.msra.gmra.mrb[4].mxu0 %v1407_v23  ;;  %1881 = vmatmul.mubr.bf16.vlgmr.msra.gmra.mrb[4].mxu1 %v1409_v20 }
 0x40b   : > { %v1841_v27 = vpop.f32.mrb[4].mxu0  ;;  %v1882_v28 = vpop.f32.mrb[4].mxu1 }
 0x40c   : > { %v1842_v29 = vadd.f32 %v1841_v27, %v1480_v25  ;;  %v1843_v30 = vpop.f32.mrb[5].mxu0  ;;  %v1884_v31 = vpop.f32.mrb[5].mxu1 }
 0x40d   : > { %v1844_v32 = vadd.f32 %v1843_v30, %v1484_v26  ;;  %v1845_v33 = vpop.f32.mrb[6].mxu0  ;;  %v1886_v34 = vpop.f32.mrb[6].mxu1 }
 0x40e   : > { %v1883_v35 = vadd.f32 %v1882_v28, %v1842_v29  ;;  %v1846_v36 = vpop.f32.mrb[7].mxu0  ;;  %v1887_v37 = vpop.f32.mrb[7].mxu1 }
 0x40f   : > { %v1885_v38 = vadd.f32 %v1884_v31, %v1844_v32 }
 0x411   : > { %v1889_v39 = vmul.f32 1.442695, %v1885_v38 }
 0x413   : > { %2532 = vpow2.f32 %v1889_v39 }
 0x41d   : > { %v2533_v41 = vpop.eup %2532 }
 0x41e   : > { %v1891_v42 = vmul.f32 %v2533_v41, %v1105_v40 }
 0x420   : > { %v1892_v43 = vadd.f32 %v1891_v42, %v1883_v35 }
 0x422   : > { %1893 = vst [vmem:[%s3063_s5] sm:$0xff] %v1892_v43 }
 0x423 PF: > { %p18_p6 = scmp.ge.s32.totalorder %s2694_s23, 4   ;;  %s3070_s18 = smov %s2624_s19 }
 0x424   : > { %s3071_s19 = smov %s2628_s20  ;;  %s3072_s20 = smov %s2704_s26 }
 0x425   : > { %s3073_s21 = smov %s2694_s23  ;;  %20 = sbr.rel (!%p18_p6) target bundleno = 5 (0x5), region = 103 }
 0x42c   :  { %1905 = vsyncpa [#allocation3], 1 }
 0x42d   :  { %1907 = vsyncpa [#allocation3 + $0x1], 1 }
 0x42e   :  { %1908 = vsyncpa [#allocation5], 1 }
 0x42f   :  { %1910 = vsyncpa [#allocation5 + $0x1], 1 }

// kernel: realnvp_forward.3
= control target key start
LH: loop header
LB: loop body
LE: loop exit
PB: predicated region body
PF: predicated region fallthrough
CT: control target
= control target key end

     0   :  { %s2496_s18 = smov 0   ;;  %s2749_s0 = inlined_call_operand.vmem [shape: f32[8,256], index: 0, kind: input, shape index: {}, may-alias: {0,5}]   ;;  %s2750_s1 = inlined_call_operand.vmem [shape: bf16[4,128,512], index: 1, kind: input, shape index: {}]   ;;  %s2751_s2 = inlined_call_operand.vmem [shape: f32[4,1,512], index: 2, kind: input, shape index: {}]   ;;  %s2752_s3 = inlined_call_operand.vmem [shape: bf16[4,512,256], index: 3, kind: input, shape index: {}]   ;;  %s2753_s4 = inlined_call_operand.vmem [shape: f32[4,1,256], index: 4, kind: input, shape index: {}]   ;;  %s2754_s5 = inlined_call_operand.vmem [shape: f32[8,256], index: 5, kind: output, shape index: {}, may-alias: {0,5}]  }
   0x1 LB: > { %s2502_s19 = sadd.s32 4294967295, %s2462_s18   ;;  %p1949_p0 = scmp.ge.s32.totalorder %s2462_s18, 1  ;;  %s2462_s18 = sphi %s2496_s18, %s15_s18  }
   0x2   : > { %p226_p1 = scmp.lt.s32.totalorder %s2462_s18, 3 }
   0x4   : > { %p227_p2 = pnand %p1949_p0, %p226_p1 }
   0x5   : > { %s266_s20 = sadd.s32 (!%p227_p2), 2, %s2502_s19  ;;  %p1956_p4 = scmp.ne.s32.totalorder (!%p227_p2), %s2502_s19, 0 }
   0x6   : > { %230 = sbr.rel (%p227_p2) target bundleno = 994 (0x3e2), region = 40  ;;  %p267_p3 = scmp.lt.s32.totalorder (!%p227_p2), %s266_s20, 3 }
   0xd   : > { %s2756_s20 = smov (!%p267_p3, %s266_s20), 3  ;;  %296 = sbr.rel (%p1956_p4) target bundleno = 504 (0x1f8), region = 44 }
   0xe   : > { %s2152_s21 = sshll.u32 %s2756_s20, 8  ;;  %s1952_s22 = sshll.u32 %s2756_s20, 2  ;;  %v2464_v2 = vmov (!%p1956_p4), 0   ;;  %v297_v27 = vld [vmem:[%s2749_s0] sm:$0xff] (!%p1956_p4) }
   0xf   : > { %s2510_s25 = scalar_lea.vmem %s2750_s1, %s2152_s21  ;;  %s2515_s28 = scalar_lea.vmem %s2751_s2, %s1952_s22  ;;  %547 = vmatprep.mubr.bf16.mxu0 (!%p1956_p4), %v2464_v2  ;;  %588 = vmatprep.mubr.bf16.mxu1 (!%p1956_p4), %v2464_v2  ;;  %298 = vst [vmem:[%s2754_s5] sm:$0xff] (!%p1956_p4), %v297_v27  ;;  %v300_v36 = vpack.c.bf16 (!%p1956_p4), %v297_v27, %v297_v27 }
  0x10   : > { %s2153_s29 = sshll.u32 %s2756_s20, 9  ;;  %s1955_s30 = sshll.u32 %s2756_s20, 1  ;;  %v2164_v0 = vld [vmem:[%s2510_s25 + $0x4] ss:$16 sps:$4 sm:$0xff] (!%p1956_p4)   ;;  %v2166_v1 = vld [vmem:[%s2510_s25 + $0xc] ss:$16 sps:$4 sm:$0xff] (!%p1956_p4)  }
  0x11   : > { %s2520_s8 = scalar_lea.vmem %s2752_s3, %s2153_s29  ;;  %s2525_s11 = scalar_lea.vmem %s2753_s4, %s1955_s30  ;;  %515 = vmatprep.subr.bf16.mxu0 (!%p1956_p4), %v2164_v0  ;;  %v2168_v3 = vld [vmem:[%s2510_s25] ss:$16 sps:$4 sm:$0xff] (!%p1956_p4)   ;;  %v2169_v4 = vld [vmem:[%s2510_s25 + $0x8] ss:$16 sps:$4 sm:$0xff] (!%p1956_p4)   ;;  %556 = vmatprep.subr.bf16.mxu1 (!%p1956_p4), %v2166_v1  ;;  %v2170_v5 = vld [vmem:[%s2510_s25 + $0x24] ss:$16 sps:$4 sm:$0xff] (!%p1956_p4)  }
  0x12   : > { %516 = vmatpush1.bf16.msra.mxu0 (!%p1956_p4), %v2168_v3  ;;  %557 = vmatpush1.bf16.msra.mxu1 (!%p1956_p4), %v2169_v4  ;;  %v2172_v6 = vld [vmem:[%s2510_s25 + $0x2c] ss:$16 sps:$4 sm:$0xff] (!%p1956_p4)   ;;  %v2174_v7 = vld [vmem:[%s2510_s25 + $0x20] ss:$16 sps:$4 sm:$0xff] (!%p1956_p4)   ;;  %v2175_v8 = vld [vmem:[%s2510_s25 + $0x28] ss:$16 sps:$4 sm:$0xff] (!%p1956_p4)  }
  0x13   : > { %517 = vmatprep.subr.bf16.mxu0 (!%p1956_p4), %v2170_v5  ;;  %558 = vmatprep.subr.bf16.mxu1 (!%p1956_p4), %v2172_v6  ;;  %v2176_v9 = vld [vmem:[%s2510_s25 + $0x44] ss:$16 sps:$4 sm:$0xff] (!%p1956_p4)   ;;  %v2178_v10 = vld [vmem:[%s2510_s25 + $0x4c] ss:$16 sps:$4 sm:$0xff] (!%p1956_p4)   ;;  %v2180_v11 = vld [vmem:[%s2510_s25 + $0x40] ss:$16 sps:$4 sm:$0xff] (!%p1956_p4)  }
  0x14   : > { %v2181_v12 = vld [vmem:[%s2510_s25 + $0x48] ss:$16 sps:$4 sm:$0xff]   ;;  %v2182_v13 = vld [vmem:[%s2510_s25 + $0x64] ss:$16 sps:$4 sm:$0xff]   ;;  %v2184_v14 = vld [vmem:[%s2510_s25 + $0x6c] ss:$16 sps:$4 sm:$0xff]  }
  0x15   : > { %v2186_v15 = vld [vmem:[%s2510_s25 + $0x60] ss:$16 sps:$4 sm:$0xff]   ;;  %v2187_v16 = vld [vmem:[%s2510_s25 + $0x68] ss:$16 sps:$4 sm:$0xff]   ;;  %v2188_v17 = vld [vmem:[%s2510_s25 + $0x84] ss:$16 sps:$4 sm:$0xff]  }
  0x16   : > { %518 = vmatpush1.bf16.msra.mxu0 %v2174_v7  ;;  %559 = vmatpush1.bf16.msra.mxu1 %v2175_v8  ;;  %v2190_v18 = vld [vmem:[%s2510_s25 + $0x8c] ss:$16 sps:$4 sm:$0xff]   ;;  %v2192_v19 = vld [vmem:[%s2510_s25 + $0x80] ss:$16 sps:$4 sm:$0xff]   ;;  %v2193_v20 = vld [vmem:[%s2510_s25 + $0x88] ss:$16 sps:$4 sm:$0xff]  }
  0x17   : > { %519 = vmatprep.subr.bf16.mxu0 %v2176_v9  ;;  %560 = vmatprep.subr.bf16.mxu1 %v2178_v10  ;;  %v2194_v21 = vld [vmem:[%s2510_s25 + $0xa4] ss:$16 sps:$4 sm:$0xff]   ;;  %v2196_v22 = vld [vmem:[%s2510_s25 + $0xac] ss:$16 sps:$4 sm:$0xff]   ;;  %v2198_v23 = vld [vmem:[%s2510_s25 + $0xa0] ss:$16 sps:$4 sm:$0xff]  }
  0x18   : > { %v2199_v24 = vld [vmem:[%s2510_s25 + $0xa8] ss:$16 sps:$4 sm:$0xff]   ;;  %v2200_v25 = vld [vmem:[%s2510_s25 + $0xc4] ss:$16 sps:$4 sm:$0xff]   ;;  %v2202_v26 = vld [vmem:[%s2510_s25 + $0xcc] ss:$16 sps:$4 sm:$0xff]  }
  0x19   : > { %v2204_v28 = vld [vmem:[%s2510_s25 + $0xc0] ss:$16 sps:$4 sm:$0xff]   ;;  %v2205_v29 = vld [vmem:[%s2510_s25 + $0xc8] ss:$16 sps:$4 sm:$0xff]   ;;  %v2206_v30 = vld [vmem:[%s2510_s25 + $0xe4] ss:$16 sps:$4 sm:$0xff]  }
  0x1a   : > { %520 = vmatpush1.bf16.msra.mxu0 %v2180_v11  ;;  %561 = vmatpush1.bf16.msra.mxu1 %v2181_v12  ;;  %v2208_v31 = vld [vmem:[%s2510_s25 + $0xec] ss:$16 sps:$4 sm:$0xff]   ;;  %v2210_v32 = vld [vmem:[%s2510_s25 + $0xe0] ss:$16 sps:$4 sm:$0xff]   ;;  %v2211_v33 = vld [vmem:[%s2510_s25 + $0xe8] ss:$16 sps:$4 sm:$0xff]  }
  0x1b   : > { %521 = vmatprep.subr.bf16.mxu0 %v2182_v13  ;;  %562 = vmatprep.subr.bf16.mxu1 %v2184_v14  ;;  %v2214_v34 = vld [vmem:[%s2520_s8 + $0x4] ss:$8 sps:$4 sm:$0xff]   ;;  %v2212_v37 = vld [vmem:[%s2520_s8] ss:$8 sps:$4 sm:$0xff]   ;;  %v2220_v39 = vld [vmem:[%s2520_s8 + $0x14] ss:$8 sps:$4 sm:$0xff]  }
  0x1c   : > { %v2217_v35 = vld [vmem:[%s2520_s8 + $0x104] ss:$8 sps:$4 sm:$0xff]   ;;  %v2215_v38 = vld [vmem:[%s2520_s8 + $0x100] ss:$8 sps:$4 sm:$0xff]   ;;  %v2223_v40 = vld [vmem:[%s2520_s8 + $0x114] ss:$8 sps:$4 sm:$0xff]  }
  0x1d   : > { %v2218_v41 = vld [vmem:[%s2520_s8 + $0x10] ss:$8 sps:$4 sm:$0xff]   ;;  %v2226_v43 = vld [vmem:[%s2520_s8 + $0x24] ss:$8 sps:$4 sm:$0xff]   ;;  %v2224_v45 = vld [vmem:[%s2520_s8 + $0x20] ss:$8 sps:$4 sm:$0xff]  }
  0x1e   : > { %522 = vmatpush1.bf16.msra.mxu0 %v2186_v15  ;;  %563 = vmatpush1.bf16.msra.mxu1 %v2187_v16  ;;  %v2221_v42 = vld [vmem:[%s2520_s8 + $0x110] ss:$8 sps:$4 sm:$0xff]   ;;  %v2229_v44 = vld [vmem:[%s2520_s8 + $0x124] ss:$8 sps:$4 sm:$0xff]   ;;  %v2227_v46 = vld [vmem:[%s2520_s8 + $0x120] ss:$8 sps:$4 sm:$0xff]  }
  0x1f   : > { %523 = vmatprep.subr.bf16.mxu0 %v2188_v17  ;;  %564 = vmatprep.subr.bf16.mxu1 %v2190_v18  ;;  %v2232_v47 = vld [vmem:[%s2520_s8 + $0x34] ss:$8 sps:$4 sm:$0xff]   ;;  %v2230_v49 = vld [vmem:[%s2520_s8 + $0x30] ss:$8 sps:$4 sm:$0xff]   ;;  %v2238_v51 = vld [vmem:[%s2520_s8 + $0x44] ss:$8 sps:$4 sm:$0xff]  }
  0x20   : > { %v2235_v48 = vld [vmem:[%s2520_s8 + $0x134] ss:$8 sps:$4 sm:$0xff]   ;;  %v2233_v50 = vld [vmem:[%s2520_s8 + $0x130] ss:$8 sps:$4 sm:$0xff]   ;;  %v2241_v52 = vld [vmem:[%s2520_s8 + $0x144] ss:$8 sps:$4 sm:$0xff]  }
  0x21   : > { %v2236_v53 = vld [vmem:[%s2520_s8 + $0x40] ss:$8 sps:$4 sm:$0xff]   ;;  %v2244_v55 = vld [vmem:[%s2520_s8 + $0x54] ss:$8 sps:$4 sm:$0xff]   ;;  %v2242_v57 = vld [vmem:[%s2520_s8 + $0x50] ss:$8 sps:$4 sm:$0xff]  }
  0x22   : > { %524 = vmatpush1.bf16.msra.mxu0 %v2192_v19  ;;  %565 = vmatpush1.bf16.msra.mxu1 %v2193_v20  ;;  %v2239_v54 = vld [vmem:[%s2520_s8 + $0x140] ss:$8 sps:$4 sm:$0xff]   ;;  %v2247_v56 = vld [vmem:[%s2520_s8 + $0x154] ss:$8 sps:$4 sm:$0xff]   ;;  %v2245_v58 = vld [vmem:[%s2520_s8 + $0x150] ss:$8 sps:$4 sm:$0xff]  }
  0x23   : > { %525 = vmatprep.subr.bf16.mxu0 %v2194_v21  ;;  %566 = vmatprep.subr.bf16.mxu1 %v2196_v22  ;;  %v2250_v59 = vld [vmem:[%s2520_s8 + $0x64] ss:$8 sps:$4 sm:$0xff]   ;;  %v2248_v61 = vld [vmem:[%s2520_s8 + $0x60] ss:$8 sps:$4 sm:$0xff]   ;;  %v2256_v63 = vld [vmem:[%s2520_s8 + $0x74] ss:$8 sps:$4 sm:$0xff]  }
  0x24   : > { %v2253_v60 = vld [vmem:[%s2520_s8 + $0x164] ss:$8 sps:$4 sm:$0xff]   ;;  %v2251_v62 = vld [vmem:[%s2520_s8 + $0x160] ss:$8 sps:$4 sm:$0xff]   ;;  %v2259_v0 = vld [vmem:[%s2520_s8 + $0x174] ss:$8 sps:$4 sm:$0xff]  }
  0x25   : > { %v2254_v1 = vld [vmem:[%s2520_s8 + $0x70] ss:$8 sps:$4 sm:$0xff]   ;;  %v2262_v3 = vld [vmem:[%s2520_s8 + $0x84] ss:$8 sps:$4 sm:$0xff]   ;;  %v2260_v5 = vld [vmem:[%s2520_s8 + $0x80] ss:$8 sps:$4 sm:$0xff]  }
  0x26   : > { %526 = vmatpush1.bf16.msra.mxu0 %v2198_v23  ;;  %567 = vmatpush1.bf16.msra.mxu1 %v2199_v24  ;;  %v2257_v2 = vld [vmem:[%s2520_s8 + $0x170] ss:$8 sps:$4 sm:$0xff]   ;;  %v2265_v4 = vld [vmem:[%s2520_s8 + $0x184] ss:$8 sps:$4 sm:$0xff]   ;;  %v2263_v6 = vld [vmem:[%s2520_s8 + $0x180] ss:$8 sps:$4 sm:$0xff]  }
  0x27   : > { %527 = vmatprep.subr.bf16.mxu0 %v2200_v25  ;;  %568 = vmatprep.subr.bf16.mxu1 %v2202_v26  ;;  %v2268_v7 = vld [vmem:[%s2520_s8 + $0x94] ss:$8 sps:$4 sm:$0xff]   ;;  %v2266_v9 = vld [vmem:[%s2520_s8 + $0x90] ss:$8 sps:$4 sm:$0xff]   ;;  %v2274_v11 = vld [vmem:[%s2520_s8 + $0xa4] ss:$8 sps:$4 sm:$0xff]  }
  0x28   : > { %v2271_v8 = vld [vmem:[%s2520_s8 + $0x194] ss:$8 sps:$4 sm:$0xff]   ;;  %v2269_v10 = vld [vmem:[%s2520_s8 + $0x190] ss:$8 sps:$4 sm:$0xff]   ;;  %v2277_v12 = vld [vmem:[%s2520_s8 + $0x1a4] ss:$8 sps:$4 sm:$0xff]  }
  0x29   : > { %v2272_v13 = vld [vmem:[%s2520_s8 + $0xa0] ss:$8 sps:$4 sm:$0xff]   ;;  %v2280_v15 = vld [vmem:[%s2520_s8 + $0xb4] ss:$8 sps:$4 sm:$0xff]   ;;  %v2278_v17 = vld [vmem:[%s2520_s8 + $0xb0] ss:$8 sps:$4 sm:$0xff]  }
  0x2a   : > { %528 = vmatpush1.bf16.msra.mxu0 %v2204_v28  ;;  %569 = vmatpush1.bf16.msra.mxu1 %v2205_v29  ;;  %v2275_v14 = vld [vmem:[%s2520_s8 + $0x1a0] ss:$8 sps:$4 sm:$0xff]   ;;  %v2283_v16 = vld [vmem:[%s2520_s8 + $0x1b4] ss:$8 sps:$4 sm:$0xff]   ;;  %v2281_v18 = vld [vmem:[%s2520_s8 + $0x1b0] ss:$8 sps:$4 sm:$0xff]  }
  0x2b   : > { %529 = vmatprep.subr.bf16.mxu0 %v2206_v30  ;;  %570 = vmatprep.subr.bf16.mxu1 %v2208_v31  ;;  %v2286_v19 = vld [vmem:[%s2520_s8 + $0xc4] ss:$8 sps:$4 sm:$0xff]   ;;  %v2284_v21 = vld [vmem:[%s2520_s8 + $0xc0] ss:$8 sps:$4 sm:$0xff]   ;;  %v2292_v23 = vld [vmem:[%s2520_s8 + $0xd4] ss:$8 sps:$4 sm:$0xff]  }
  0x2c   : > { %v2289_v20 = vld [vmem:[%s2520_s8 + $0x1c4] ss:$8 sps:$4 sm:$0xff]   ;;  %v2287_v22 = vld [vmem:[%s2520_s8 + $0x1c0] ss:$8 sps:$4 sm:$0xff]   ;;  %v2295_v24 = vld [vmem:[%s2520_s8 + $0x1d4] ss:$8 sps:$4 sm:$0xff]  }
  0x2d   : > { %v2290_v25 = vld [vmem:[%s2520_s8 + $0xd0] ss:$8 sps:$4 sm:$0xff]   ;;  %v2298_v27 = vld [vmem:[%s2520_s8 + $0xe4] ss:$8 sps:$4 sm:$0xff]   ;;  %v2296_v29 = vld [vmem:[%s2520_s8 + $0xe0] ss:$8 sps:$4 sm:$0xff]  }
  0x2e   : > { %530 = vmatpush1.bf16.msra.mxu0 %v2210_v32  ;;  %571 = vmatpush1.bf16.msra.mxu1 %v2211_v33  ;;  %v2293_v26 = vld [vmem:[%s2520_s8 + $0x1d0] ss:$8 sps:$4 sm:$0xff]   ;;  %v2301_v28 = vld [vmem:[%s2520_s8 + $0x1e4] ss:$8 sps:$4 sm:$0xff]   ;;  %v2299_v30 = vld [vmem:[%s2520_s8 + $0x1e0] ss:$8 sps:$4 sm:$0xff]  }
  0x2f   : > { %1001 = vmatprep.subr.bf16.mxu0 %v2214_v34  ;;  %1042 = vmatprep.subr.bf16.mxu1 %v2217_v35  ;;  %v2304_v31 = vld [vmem:[%s2520_s8 + $0xf4] ss:$8 sps:$4 sm:$0xff]   ;;  %v2302_v33 = vld [vmem:[%s2520_s8 + $0xf0] ss:$8 sps:$4 sm:$0xff]   ;;  %v335_v35 = vlaneseq }
  0x30   : > { %v2307_v32 = vld [vmem:[%s2520_s8 + $0x1f4] ss:$8 sps:$4 sm:$0xff]   ;;  %v2305_v34 = vld [vmem:[%s2520_s8 + $0x1f0] ss:$8 sps:$4 sm:$0xff]  }
  0x31   : > { %548 = vmatmul.mubr.bf16.vlgmr.msra.gmra.mrb[0].mxu0 %v300_v36  ;;  %589 = vmatmul.mubr.bf16.vlgmr.msra.gmra.mrb[0].mxu1 %v300_v36  ;;  %v336_v36 = vshrl.u32 %v335_v35, 7 }
  0x32   : > { %1002 = vmatpush1.bf16.msra.mxu0 %v2212_v37  ;;  %1043 = vmatpush1.bf16.msra.mxu1 %v2215_v38 }
  0x33   : > { %1003 = vmatprep.subr.bf16.mxu0 %v2220_v39  ;;  %1044 = vmatprep.subr.bf16.mxu1 %v2223_v40  ;;  %v337_v37 = vsub.s32 0, %v336_v36  ;;  %v345_v38 = vsub.s32 2, %v336_v36  ;;  %v333_v39 = vld [vmem:[%s2515_s28] sm:$0xf]  ;;  %v341_v40 = vsub.s32 1, %v336_v36 }
  0x36   : > { %1004 = vmatpush1.bf16.msra.mxu0 %v2218_v41  ;;  %1045 = vmatpush1.bf16.msra.mxu1 %v2221_v42  ;;  %v349_v41 = vsub.s32 3, %v336_v36  ;;  %v338_v42 = vrot.slane %v333_v39, %v337_v37 }
  0x37   : > { %1005 = vmatprep.subr.bf16.mxu0 %v2226_v43  ;;  %1046 = vmatprep.subr.bf16.mxu1 %v2229_v44  ;;  %v346_v43 = vrot.slane %v333_v39, %v345_v38  ;;  %v342_v44 = vrot.slane %v333_v39, %v341_v40 }
  0x3a   : > { %1006 = vmatpush1.bf16.msra.mxu0 %v2224_v45  ;;  %1047 = vmatpush1.bf16.msra.mxu1 %v2227_v46  ;;  %v350_v45 = vrot.slane %v333_v39, %v349_v41 }
  0x3b   : > { %1007 = vmatprep.subr.bf16.mxu0 %v2232_v47  ;;  %1048 = vmatprep.subr.bf16.mxu1 %v2235_v48 }
  0x3e   : > { %1008 = vmatpush1.bf16.msra.mxu0 %v2230_v49  ;;  %1049 = vmatpush1.bf16.msra.mxu1 %v2233_v50 }
  0x3f   : > { %1009 = vmatprep.subr.bf16.mxu0 %v2238_v51  ;;  %1050 = vmatprep.subr.bf16.mxu1 %v2241_v52 }
  0x42   : > { %1010 = vmatpush1.bf16.msra.mxu0 %v2236_v53  ;;  %1051 = vmatpush1.bf16.msra.mxu1 %v2239_v54 }
  0x43   : > { %1011 = vmatprep.subr.bf16.mxu0 %v2244_v55  ;;  %1052 = vmatprep.subr.bf16.mxu1 %v2247_v56 }
  0x46   : > { %1012 = vmatpush1.bf16.msra.mxu0 %v2242_v57  ;;  %1053 = vmatpush1.bf16.msra.mxu1 %v2245_v58 }
  0x47   : > { %1013 = vmatprep.subr.bf16.mxu0 %v2250_v59  ;;  %1054 = vmatprep.subr.bf16.mxu1 %v2253_v60 }
  0x4a   : > { %1014 = vmatpush1.bf16.msra.mxu0 %v2248_v61  ;;  %1055 = vmatpush1.bf16.msra.mxu1 %v2251_v62 }
  0x4b   : > { %1015 = vmatprep.subr.bf16.mxu0 %v2256_v63  ;;  %1056 = vmatprep.subr.bf16.mxu1 %v2259_v0 }
  0x4e   : > { %1016 = vmatpush1.bf16.msra.mxu0 %v2254_v1  ;;  %1057 = vmatpush1.bf16.msra.mxu1 %v2257_v2  ;;  %v669_v2 = vld [vmem:[%s2525_s11] sm:$0x3] }
  0x4f   : > { %1017 = vmatprep.subr.bf16.mxu0 %v2262_v3  ;;  %1058 = vmatprep.subr.bf16.mxu1 %v2265_v4  ;;  %v674_v3 = vrot.slane %v669_v2, %v337_v37  ;;  %v678_v4 = vrot.slane %v669_v2, %v341_v40 }
  0x52   : > { %1018 = vmatpush1.bf16.msra.mxu0 %v2260_v5  ;;  %1059 = vmatpush1.bf16.msra.mxu1 %v2263_v6 }
  0x53   : > { %1019 = vmatprep.subr.bf16.mxu0 %v2268_v7  ;;  %1060 = vmatprep.subr.bf16.mxu1 %v2271_v8 }
  0x56   : > { %1020 = vmatpush1.bf16.msra.mxu0 %v2266_v9  ;;  %1061 = vmatpush1.bf16.msra.mxu1 %v2269_v10 }
  0x57   : > { %1021 = vmatprep.subr.bf16.mxu0 %v2274_v11  ;;  %1062 = vmatprep.subr.bf16.mxu1 %v2277_v12 }
  0x5a   : > { %1022 = vmatpush1.bf16.msra.mxu0 %v2272_v13  ;;  %1063 = vmatpush1.bf16.msra.mxu1 %v2275_v14 }
  0x5b   : > { %1023 = vmatprep.subr.bf16.mxu0 %v2280_v15  ;;  %1064 = vmatprep.subr.bf16.mxu1 %v2283_v16 }
  0x5e   : > { %1024 = vmatpush1.bf16.msra.mxu0 %v2278_v17  ;;  %1065 = vmatpush1.bf16.msra.mxu1 %v2281_v18  ;;  %v299_v18 = vld [vmem:[%s2749_s0 + $0x8] sm:$0xff] }
  0x5f   : > { %1025 = vmatprep.subr.bf16.mxu0 %v2286_v19  ;;  %1066 = vmatprep.subr.bf16.mxu1 %v2289_v20 }
  0x62   : > { %1026 = vmatpush1.bf16.msra.mxu0 %v2284_v21  ;;  %1067 = vmatpush1.bf16.msra.mxu1 %v2287_v22 }
  0x63   : > { %1027 = vmatprep.subr.bf16.mxu0 %v2292_v23  ;;  %1068 = vmatprep.subr.bf16.mxu1 %v2295_v24 }
  0x66   : > { %1028 = vmatpush1.bf16.msra.mxu0 %v2290_v25  ;;  %1069 = vmatpush1.bf16.msra.mxu1 %v2293_v26 }
  0x67   : > { %1029 = vmatprep.subr.bf16.mxu0 %v2298_v27  ;;  %1070 = vmatprep.subr.bf16.mxu1 %v2301_v28 }
  0x6a   : > { %1030 = vmatpush1.bf16.msra.mxu0 %v2296_v29  ;;  %1071 = vmatpush1.bf16.msra.mxu1 %v2299_v30 }
  0x6b   : > { %1031 = vmatprep.subr.bf16.mxu0 %v2304_v31  ;;  %1072 = vmatprep.subr.bf16.mxu1 %v2307_v32 }
  0x6e   : > { %1032 = vmatpush1.bf16.msra.mxu0 %v2302_v33  ;;  %1073 = vmatpush1.bf16.msra.mxu1 %v2305_v34 }
 0x104   : > { %v549_v46 = vpop.f32.mrb[0].mxu0  ;;  %v590_v47 = vpop.f32.mrb[0].mxu1 }
 0x105   : > { %v550_v48 = vadd.f32 %v549_v46, %v338_v42  ;;  %v591_v49 = vadd.f32 %v590_v47, %v346_v43  ;;  %v551_v50 = vpop.f32.mrb[1].mxu0  ;;  %v592_v51 = vpop.f32.mrb[1].mxu1 }
 0x106   : > { %v552_v52 = vadd.f32 %v551_v50, %v342_v44  ;;  %v593_v53 = vadd.f32 %v592_v51, %v350_v45  ;;  %v553_v54 = vpop.f32.mrb[2].mxu0  ;;  %v594_v55 = vpop.f32.mrb[2].mxu1 }
 0x107   : > { %v597_v56 = vmax.f32 %v550_v48, 0.0  ;;  %v599_v57 = vmax.f32 %v591_v49, 0.0  ;;  %v554_v58 = vpop.f32.mrb[3].mxu0  ;;  %v595_v59 = vpop.f32.mrb[3].mxu1 }
 0x108   : > { %v598_v60 = vmax.f32 %v552_v52, 0.0  ;;  %v600_v61 = vmax.f32 %v593_v53, 0.0 }
 0x109   : > { %v603_v62 = vpack.c.bf16 %v599_v57, %v599_v57  ;;  %v601_v1 = vpack.c.bf16 %v597_v56, %v597_v56 }
 0x10a   : > { %v602_v63 = vpack.c.bf16 %v598_v60, %v598_v60  ;;  %v604_v0 = vpack.c.bf16 %v600_v61, %v600_v61 }
 0x10c   : > { %1033 = vmatprep.mubr.bf16.mxu0 %v602_v63  ;;  %1074 = vmatprep.mubr.bf16.mxu1 %v604_v0 }
 0x10d   : > { %1034 = vmatmul.mubr.bf16.vlgmr.msra.gmra.mrb[4].mxu0 %v601_v1  ;;  %1075 = vmatmul.mubr.bf16.vlgmr.msra.gmra.mrb[4].mxu1 %v603_v62 }
 0x1e0   : > { %v1035_v5 = vpop.f32.mrb[4].mxu0  ;;  %v1076_v6 = vpop.f32.mrb[4].mxu1 }
 0x1e1   : > { %v1036_v7 = vadd.f32 %v1035_v5, %v674_v3  ;;  %v1037_v8 = vpop.f32.mrb[5].mxu0  ;;  %v1078_v9 = vpop.f32.mrb[5].mxu1 }
 0x1e2   : > { %v1038_v10 = vadd.f32 %v1037_v8, %v678_v4  ;;  %v1039_v11 = vpop.f32.mrb[6].mxu0  ;;  %v1080_v12 = vpop.f32.mrb[6].mxu1 }
 0x1e3   : > { %v1077_v13 = vadd.f32 %v1076_v6, %v1036_v7  ;;  %v1040_v14 = vpop.f32.mrb[7].mxu0  ;;  %v1081_v15 = vpop.f32.mrb[7].mxu1 }
 0x1e4   : > { %v1079_v16 = vadd.f32 %v1078_v9, %v1038_v10 }
 0x1e6   : > { %v1083_v17 = vmul.f32 1.442695, %v1079_v16 }
 0x1e8   : > { %2308 = vpow2.f32 %v1083_v17 }
 0x1f2   : > { %v2309_v19 = vpop.eup %2308 }
 0x1f3   : > { %v1085_v20 = vmul.f32 %v2309_v19, %v299_v18 }
 0x1f5   : > { %v1086_v21 = vadd.f32 %v1085_v20, %v1077_v13 }
 0x1f7   : > { %1087 = vst [vmem:[%s2754_s5 + $0x8] sm:$0xff] %v1086_v21 }
 0x1f8 PF: > { %p2053_p5 = scmp.ne.s32.totalorder %s2502_s19, 1 }
 0x1f9   : > { %v2310_v22 = vld [vmem:[%s2510_s25 + $0x4] ss:$16 sps:$4 sm:$0xff] (!%p2053_p5)   ;;  %v2312_v23 = vld [vmem:[%s2510_s25 + $0xc] ss:$16 sps:$4 sm:$0xff] (!%p2053_p5)   ;;  %v2465_v24 = vmov (!%p2053_p5), 0  }
 0x1fa   : > { %1091 = sbr.rel (%p2053_p5) target bundleno = 994 (0x3e2), region = 48  ;;  %1341 = vmatprep.mubr.bf16.mxu0 (!%p2053_p5), %v2465_v24  ;;  %1382 = vmatprep.mubr.bf16.mxu1 (!%p2053_p5), %v2465_v24  ;;  %v2314_v25 = vld [vmem:[%s2510_s25] ss:$16 sps:$4 sm:$0xff] (!%p2053_p5)   ;;  %v2315_v26 = vld [vmem:[%s2510_s25 + $0x8] ss:$16 sps:$4 sm:$0xff] (!%p2053_p5)  }
 0x1fb   : > { %1309 = vmatprep.subr.bf16.mxu0 (!%p2053_p5), %v2310_v22  ;;  %1350 = vmatprep.subr.bf16.mxu1 (!%p2053_p5), %v2312_v23  ;;  %v2316_v27 = vld [vmem:[%s2510_s25 + $0x24] ss:$16 sps:$4 sm:$0xff] (!%p2053_p5)   ;;  %v2318_v28 = vld [vmem:[%s2510_s25 + $0x2c] ss:$16 sps:$4 sm:$0xff] (!%p2053_p5)   ;;  %v2320_v29 = vld [vmem:[%s2510_s25 + $0x20] ss:$16 sps:$4 sm:$0xff] (!%p2053_p5)  }
 0x1fc   : > { %1310 = vmatpush1.bf16.msra.mxu0 (!%p2053_p5), %v2314_v25  ;;  %1351 = vmatpush1.bf16.msra.mxu1 (!%p2053_p5), %v2315_v26  ;;  %v2321_v30 = vld [vmem:[%s2510_s25 + $0x28] ss:$16 sps:$4 sm:$0xff] (!%p2053_p5)   ;;  %v2322_v31 = vld [vmem:[%s2510_s25 + $0x44] ss:$16 sps:$4 sm:$0xff] (!%p2053_p5)   ;;  %v2324_v32 = vld [vmem:[%s2510_s25 + $0x4c] ss:$16 sps:$4 sm:$0xff] (!%p2053_p5)  }
 0x1fd   : > { %1311 = vmatprep.subr.bf16.mxu0 (!%p2053_p5), %v2316_v27  ;;  %1352 = vmatprep.subr.bf16.mxu1 (!%p2053_p5), %v2318_v28  ;;  %v2326_v33 = vld [vmem:[%s2510_s25 + $0x40] ss:$16 sps:$4 sm:$0xff] (!%p2053_p5)   ;;  %v2327_v34 = vld [vmem:[%s2510_s25 + $0x48] ss:$16 sps:$4 sm:$0xff] (!%p2053_p5)   ;;  %v2328_v35 = vld [vmem:[%s2510_s25 + $0x64] ss:$16 sps:$4 sm:$0xff] (!%p2053_p5)  }
 0x1fe   : > { %v2330_v36 = vld [vmem:[%s2510_s25 + $0x6c] ss:$16 sps:$4 sm:$0xff] (!%p2053_p5)   ;;  %v2332_v37 = vld [vmem:[%s2510_s25 + $0x60] ss:$16 sps:$4 sm:$0xff] (!%p2053_p5)   ;;  %v2333_v38 = vld [vmem:[%s2510_s25 + $0x68] ss:$16 sps:$4 sm:$0xff] (!%p2053_p5)  }
 0x1ff   : > { %v2334_v39 = vld [vmem:[%s2510_s25 + $0x84] ss:$16 sps:$4 sm:$0xff] (!%p2053_p5)   ;;  %v2336_v40 = vld [vmem:[%s2510_s25 + $0x8c] ss:$16 sps:$4 sm:$0xff] (!%p2053_p5)   ;;  %v2338_v41 = vld [vmem:[%s2510_s25 + $0x80] ss:$16 sps:$4 sm:$0xff] (!%p2053_p5)  }
 0x200   : > { %1312 = vmatpush1.bf16.msra.mxu0 (!%p2053_p5), %v2320_v29  ;;  %1353 = vmatpush1.bf16.msra.mxu1 (!%p2053_p5), %v2321_v30  ;;  %v2339_v42 = vld [vmem:[%s2510_s25 + $0x88] ss:$16 sps:$4 sm:$0xff] (!%p2053_p5)   ;;  %v2340_v43 = vld [vmem:[%s2510_s25 + $0xa4] ss:$16 sps:$4 sm:$0xff] (!%p2053_p5)   ;;  %v2342_v44 = vld [vmem:[%s2510_s25 + $0xac] ss:$16 sps:$4 sm:$0xff] (!%p2053_p5)  }
 0x201   : > { %1313 = vmatprep.subr.bf16.mxu0 %v2322_v31  ;;  %1354 = vmatprep.subr.bf16.mxu1 %v2324_v32  ;;  %v2344_v45 = vld [vmem:[%s2510_s25 + $0xa0] ss:$16 sps:$4 sm:$0xff]   ;;  %v2345_v46 = vld [vmem:[%s2510_s25 + $0xa8] ss:$16 sps:$4 sm:$0xff]   ;;  %v2346_v47 = vld [vmem:[%s2510_s25 + $0xc4] ss:$16 sps:$4 sm:$0xff]  }
 0x202   : > { %v2348_v48 = vld [vmem:[%s2510_s25 + $0xcc] ss:$16 sps:$4 sm:$0xff]   ;;  %v2350_v49 = vld [vmem:[%s2510_s25 + $0xc0] ss:$16 sps:$4 sm:$0xff]   ;;  %v2351_v50 = vld [vmem:[%s2510_s25 + $0xc8] ss:$16 sps:$4 sm:$0xff]  }
 0x203   : > { %v2352_v51 = vld [vmem:[%s2510_s25 + $0xe4] ss:$16 sps:$4 sm:$0xff]   ;;  %v2354_v52 = vld [vmem:[%s2510_s25 + $0xec] ss:$16 sps:$4 sm:$0xff]   ;;  %v2356_v53 = vld [vmem:[%s2510_s25 + $0xe0] ss:$16 sps:$4 sm:$0xff]  }
 0x204   : > { %1314 = vmatpush1.bf16.msra.mxu0 %v2326_v33  ;;  %1355 = vmatpush1.bf16.msra.mxu1 %v2327_v34  ;;  %v2357_v54 = vld [vmem:[%s2510_s25 + $0xe8] ss:$16 sps:$4 sm:$0xff]   ;;  %v2360_v56 = vld [vmem:[%s2520_s8 + $0x4] ss:$8 sps:$4 sm:$0xff]   ;;  %v2366_v61 = vld [vmem:[%s2520_s8 + $0x14] ss:$8 sps:$4 sm:$0xff]  }
 0x205   : > { %1315 = vmatprep.subr.bf16.mxu0 %v2328_v35  ;;  %1356 = vmatprep.subr.bf16.mxu1 %v2330_v36  ;;  %v1092_v55 = vld [vmem:[%s2754_s5 + $0x8] sm:$0xff]  ;;  %v2369_v62 = vld [vmem:[%s2520_s8 + $0x114] ss:$8 sps:$4 sm:$0xff]   ;;  %v2364_v63 = vld [vmem:[%s2520_s8 + $0x10] ss:$8 sps:$4 sm:$0xff]  }
 0x206   : > { %v2363_v57 = vld [vmem:[%s2520_s8 + $0x104] ss:$8 sps:$4 sm:$0xff]   ;;  %v1094_v58 = vpack.c.bf16 %v1092_v55, %v1092_v55  ;;  %v2358_v59 = vld [vmem:[%s2520_s8] ss:$8 sps:$4 sm:$0xff]   ;;  %v2367_v0 = vld [vmem:[%s2520_s8 + $0x110] ss:$8 sps:$4 sm:$0xff]  }
 0x207   : > { %v2361_v60 = vld [vmem:[%s2520_s8 + $0x100] ss:$8 sps:$4 sm:$0xff]   ;;  %v2372_v1 = vld [vmem:[%s2520_s8 + $0x24] ss:$8 sps:$4 sm:$0xff]   ;;  %v2378_v5 = vld [vmem:[%s2520_s8 + $0x34] ss:$8 sps:$4 sm:$0xff]  }
 0x208   : > { %1316 = vmatpush1.bf16.msra.mxu0 %v2332_v37  ;;  %1357 = vmatpush1.bf16.msra.mxu1 %v2333_v38  ;;  %v2375_v2 = vld [vmem:[%s2520_s8 + $0x124] ss:$8 sps:$4 sm:$0xff]   ;;  %v2370_v3 = vld [vmem:[%s2520_s8 + $0x20] ss:$8 sps:$4 sm:$0xff]   ;;  %v2381_v6 = vld [vmem:[%s2520_s8 + $0x134] ss:$8 sps:$4 sm:$0xff]  }
 0x209   : > { %1317 = vmatprep.subr.bf16.mxu0 %v2334_v39  ;;  %1358 = vmatprep.subr.bf16.mxu1 %v2336_v40  ;;  %v2373_v4 = vld [vmem:[%s2520_s8 + $0x120] ss:$8 sps:$4 sm:$0xff]   ;;  %v2376_v7 = vld [vmem:[%s2520_s8 + $0x30] ss:$8 sps:$4 sm:$0xff]   ;;  %v2384_v9 = vld [vmem:[%s2520_s8 + $0x44] ss:$8 sps:$4 sm:$0xff]  }
 0x20a   : > { %v2379_v8 = vld [vmem:[%s2520_s8 + $0x130] ss:$8 sps:$4 sm:$0xff]   ;;  %v2387_v10 = vld [vmem:[%s2520_s8 + $0x144] ss:$8 sps:$4 sm:$0xff]   ;;  %v2382_v11 = vld [vmem:[%s2520_s8 + $0x40] ss:$8 sps:$4 sm:$0xff]  }
 0x20b   : > { %v2385_v12 = vld [vmem:[%s2520_s8 + $0x140] ss:$8 sps:$4 sm:$0xff]   ;;  %v2390_v13 = vld [vmem:[%s2520_s8 + $0x54] ss:$8 sps:$4 sm:$0xff]   ;;  %v2388_v15 = vld [vmem:[%s2520_s8 + $0x50] ss:$8 sps:$4 sm:$0xff]  }
 0x20c   : > { %1318 = vmatpush1.bf16.msra.mxu0 %v2338_v41  ;;  %1359 = vmatpush1.bf16.msra.mxu1 %v2339_v42  ;;  %v2393_v14 = vld [vmem:[%s2520_s8 + $0x154] ss:$8 sps:$4 sm:$0xff]   ;;  %v2391_v16 = vld [vmem:[%s2520_s8 + $0x150] ss:$8 sps:$4 sm:$0xff]   ;;  %v2396_v17 = vld [vmem:[%s2520_s8 + $0x64] ss:$8 sps:$4 sm:$0xff]  }
 0x20d   : > { %1319 = vmatprep.subr.bf16.mxu0 %v2340_v43  ;;  %1360 = vmatprep.subr.bf16.mxu1 %v2342_v44  ;;  %v2399_v18 = vld [vmem:[%s2520_s8 + $0x164] ss:$8 sps:$4 sm:$0xff]   ;;  %v2394_v19 = vld [vmem:[%s2520_s8 + $0x60] ss:$8 sps:$4 sm:$0xff]   ;;  %v2402_v21 = vld [vmem:[%s2520_s8 + $0x74] ss:$8 sps:$4 sm:$0xff]  }
 0x20e   : > { %v2397_v20 = vld [vmem:[%s2520_s8 + $0x160] ss:$8 sps:$4 sm:$0xff]   ;;  %v2405_v22 = vld [vmem:[%s2520_s8 + $0x174] ss:$8 sps:$4 sm:$0xff]   ;;  %v2400_v23 = vld [vmem:[%s2520_s8 + $0x70] ss:$8 sps:$4 sm:$0xff]  }
 0x20f   : > { %v2403_v24 = vld [vmem:[%s2520_s8 + $0x170] ss:$8 sps:$4 sm:$0xff]   ;;  %v2408_v25 = vld [vmem:[%s2520_s8 + $0x84] ss:$8 sps:$4 sm:$0xff]   ;;  %v2406_v27 = vld [vmem:[%s2520_s8 + $0x80] ss:$8 sps:$4 sm:$0xff]  }
 0x210   : > { %1320 = vmatpush1.bf16.msra.mxu0 %v2344_v45  ;;  %1361 = vmatpush1.bf16.msra.mxu1 %v2345_v46  ;;  %v2411_v26 = vld [vmem:[%s2520_s8 + $0x184] ss:$8 sps:$4 sm:$0xff]   ;;  %v2409_v28 = vld [vmem:[%s2520_s8 + $0x180] ss:$8 sps:$4 sm:$0xff]   ;;  %v2414_v29 = vld [vmem:[%s2520_s8 + $0x94] ss:$8 sps:$4 sm:$0xff]  }
 0x211   : > { %1321 = vmatprep.subr.bf16.mxu0 %v2346_v47  ;;  %1362 = vmatprep.subr.bf16.mxu1 %v2348_v48  ;;  %v2417_v30 = vld [vmem:[%s2520_s8 + $0x194] ss:$8 sps:$4 sm:$0xff]   ;;  %v2412_v31 = vld [vmem:[%s2520_s8 + $0x90] ss:$8 sps:$4 sm:$0xff]   ;;  %v2420_v33 = vld [vmem:[%s2520_s8 + $0xa4] ss:$8 sps:$4 sm:$0xff]  }
 0x212   : > { %v2415_v32 = vld [vmem:[%s2520_s8 + $0x190] ss:$8 sps:$4 sm:$0xff]   ;;  %v2423_v34 = vld [vmem:[%s2520_s8 + $0x1a4] ss:$8 sps:$4 sm:$0xff]   ;;  %v2418_v35 = vld [vmem:[%s2520_s8 + $0xa0] ss:$8 sps:$4 sm:$0xff]  }
 0x213   : > { %v2421_v36 = vld [vmem:[%s2520_s8 + $0x1a0] ss:$8 sps:$4 sm:$0xff]   ;;  %v2426_v37 = vld [vmem:[%s2520_s8 + $0xb4] ss:$8 sps:$4 sm:$0xff]   ;;  %v2424_v39 = vld [vmem:[%s2520_s8 + $0xb0] ss:$8 sps:$4 sm:$0xff]  }
 0x214   : > { %1322 = vmatpush1.bf16.msra.mxu0 %v2350_v49  ;;  %1363 = vmatpush1.bf16.msra.mxu1 %v2351_v50  ;;  %v2429_v38 = vld [vmem:[%s2520_s8 + $0x1b4] ss:$8 sps:$4 sm:$0xff]   ;;  %v2427_v40 = vld [vmem:[%s2520_s8 + $0x1b0] ss:$8 sps:$4 sm:$0xff]   ;;  %v2432_v41 = vld [vmem:[%s2520_s8 + $0xc4] ss:$8 sps:$4 sm:$0xff]  }
 0x215   : > { %1323 = vmatprep.subr.bf16.mxu0 %v2352_v51  ;;  %1364 = vmatprep.subr.bf16.mxu1 %v2354_v52  ;;  %v2435_v42 = vld [vmem:[%s2520_s8 + $0x1c4] ss:$8 sps:$4 sm:$0xff]   ;;  %v2430_v43 = vld [vmem:[%s2520_s8 + $0xc0] ss:$8 sps:$4 sm:$0xff]   ;;  %v2438_v45 = vld [vmem:[%s2520_s8 + $0xd4] ss:$8 sps:$4 sm:$0xff]  }
 0x216   : > { %v2433_v44 = vld [vmem:[%s2520_s8 + $0x1c0] ss:$8 sps:$4 sm:$0xff]   ;;  %v2441_v46 = vld [vmem:[%s2520_s8 + $0x1d4] ss:$8 sps:$4 sm:$0xff]   ;;  %v2436_v47 = vld [vmem:[%s2520_s8 + $0xd0] ss:$8 sps:$4 sm:$0xff]  }
 0x217   : > { %v2439_v48 = vld [vmem:[%s2520_s8 + $0x1d0] ss:$8 sps:$4 sm:$0xff]   ;;  %v2444_v49 = vld [vmem:[%s2520_s8 + $0xe4] ss:$8 sps:$4 sm:$0xff]   ;;  %v2442_v51 = vld [vmem:[%s2520_s8 + $0xe0] ss:$8 sps:$4 sm:$0xff]  }
 0x218   : > { %1324 = vmatpush1.bf16.msra.mxu0 %v2356_v53  ;;  %1365 = vmatpush1.bf16.msra.mxu1 %v2357_v54  ;;  %v2447_v50 = vld [vmem:[%s2520_s8 + $0x1e4] ss:$8 sps:$4 sm:$0xff]   ;;  %v2445_v52 = vld [vmem:[%s2520_s8 + $0x1e0] ss:$8 sps:$4 sm:$0xff]   ;;  %v2450_v53 = vld [vmem:[%s2520_s8 + $0xf4] ss:$8 sps:$4 sm:$0xff]  }
 0x219   : > { %1795 = vmatprep.subr.bf16.mxu0 %v2360_v56  ;;  %1836 = vmatprep.subr.bf16.mxu1 %v2363_v57  ;;  %v2453_v54 = vld [vmem:[%s2520_s8 + $0x1f4] ss:$8 sps:$4 sm:$0xff]   ;;  %v2448_v55 = vld [vmem:[%s2520_s8 + $0xf0] ss:$8 sps:$4 sm:$0xff]   ;;  %v1129_v57 = vlaneseq }
 0x21a   : > { %v2451_v56 = vld [vmem:[%s2520_s8 + $0x1f0] ss:$8 sps:$4 sm:$0xff]  }
 0x21b   : > { %1342 = vmatmul.mubr.bf16.vlgmr.msra.gmra.mrb[0].mxu0 %v1094_v58  ;;  %1383 = vmatmul.mubr.bf16.vlgmr.msra.gmra.mrb[0].mxu1 %v1094_v58  ;;  %v1130_v58 = vshrl.u32 %v1129_v57, 7 }
 0x21c   : > { %1796 = vmatpush1.bf16.msra.mxu0 %v2358_v59  ;;  %1837 = vmatpush1.bf16.msra.mxu1 %v2361_v60 }
 0x21d   : > { %1797 = vmatprep.subr.bf16.mxu0 %v2366_v61  ;;  %1838 = vmatprep.subr.bf16.mxu1 %v2369_v62  ;;  %v1131_v59 = vsub.s32 0, %v1130_v58  ;;  %v1139_v60 = vsub.s32 2, %v1130_v58  ;;  %v1127_v61 = vld [vmem:[%s2515_s28] sm:$0xf]  ;;  %v1135_v62 = vsub.s32 1, %v1130_v58 }
 0x220   : > { %1798 = vmatpush1.bf16.msra.mxu0 %v2364_v63  ;;  %1839 = vmatpush1.bf16.msra.mxu1 %v2367_v0  ;;  %v1143_v63 = vsub.s32 3, %v1130_v58  ;;  %v1132_v0 = vrot.slane %v1127_v61, %v1131_v59 }
 0x221   : > { %1799 = vmatprep.subr.bf16.mxu0 %v2372_v1  ;;  %1840 = vmatprep.subr.bf16.mxu1 %v2375_v2  ;;  %v1140_v1 = vrot.slane %v1127_v61, %v1139_v60  ;;  %v1136_v2 = vrot.slane %v1127_v61, %v1135_v62 }
 0x224   : > { %1800 = vmatpush1.bf16.msra.mxu0 %v2370_v3  ;;  %1841 = vmatpush1.bf16.msra.mxu1 %v2373_v4  ;;  %v1144_v3 = vrot.slane %v1127_v61, %v1143_v63 }
 0x225   : > { %1801 = vmatprep.subr.bf16.mxu0 %v2378_v5  ;;  %1842 = vmatprep.subr.bf16.mxu1 %v2381_v6 }
 0x228   : > { %1802 = vmatpush1.bf16.msra.mxu0 %v2376_v7  ;;  %1843 = vmatpush1.bf16.msra.mxu1 %v2379_v8 }
 0x229   : > { %1803 = vmatprep.subr.bf16.mxu0 %v2384_v9  ;;  %1844 = vmatprep.subr.bf16.mxu1 %v2387_v10 }
 0x22c   : > { %1804 = vmatpush1.bf16.msra.mxu0 %v2382_v11  ;;  %1845 = vmatpush1.bf16.msra.mxu1 %v2385_v12 }
 0x22d   : > { %1805 = vmatprep.subr.bf16.mxu0 %v2390_v13  ;;  %1846 = vmatprep.subr.bf16.mxu1 %v2393_v14 }
 0x230   : > { %1806 = vmatpush1.bf16.msra.mxu0 %v2388_v15  ;;  %1847 = vmatpush1.bf16.msra.mxu1 %v2391_v16 }
 0x231   : > { %1807 = vmatprep.subr.bf16.mxu0 %v2396_v17  ;;  %1848 = vmatprep.subr.bf16.mxu1 %v2399_v18 }
 0x234   : > { %1808 = vmatpush1.bf16.msra.mxu0 %v2394_v19  ;;  %1849 = vmatpush1.bf16.msra.mxu1 %v2397_v20 }
 0x235   : > { %1809 = vmatprep.subr.bf16.mxu0 %v2402_v21  ;;  %1850 = vmatprep.subr.bf16.mxu1 %v2405_v22 }
 0x238   : > { %1810 = vmatpush1.bf16.msra.mxu0 %v2400_v23  ;;  %1851 = vmatpush1.bf16.msra.mxu1 %v2403_v24  ;;  %v1463_v24 = vld [vmem:[%s2525_s11] sm:$0x3] }
 0x239   : > { %1811 = vmatprep.subr.bf16.mxu0 %v2408_v25  ;;  %1852 = vmatprep.subr.bf16.mxu1 %v2411_v26  ;;  %v1468_v25 = vrot.slane %v1463_v24, %v1131_v59  ;;  %v1472_v26 = vrot.slane %v1463_v24, %v1135_v62 }
 0x23c   : > { %1812 = vmatpush1.bf16.msra.mxu0 %v2406_v27  ;;  %1853 = vmatpush1.bf16.msra.mxu1 %v2409_v28 }
 0x23d   : > { %1813 = vmatprep.subr.bf16.mxu0 %v2414_v29  ;;  %1854 = vmatprep.subr.bf16.mxu1 %v2417_v30 }
 0x240   : > { %1814 = vmatpush1.bf16.msra.mxu0 %v2412_v31  ;;  %1855 = vmatpush1.bf16.msra.mxu1 %v2415_v32 }
 0x241   : > { %1815 = vmatprep.subr.bf16.mxu0 %v2420_v33  ;;  %1856 = vmatprep.subr.bf16.mxu1 %v2423_v34 }
 0x244   : > { %1816 = vmatpush1.bf16.msra.mxu0 %v2418_v35  ;;  %1857 = vmatpush1.bf16.msra.mxu1 %v2421_v36 }
 0x245   : > { %1817 = vmatprep.subr.bf16.mxu0 %v2426_v37  ;;  %1858 = vmatprep.subr.bf16.mxu1 %v2429_v38 }
 0x248   : > { %1818 = vmatpush1.bf16.msra.mxu0 %v2424_v39  ;;  %1859 = vmatpush1.bf16.msra.mxu1 %v2427_v40  ;;  %v1093_v40 = vld [vmem:[%s2754_s5] sm:$0xff] }
 0x249   : > { %1819 = vmatprep.subr.bf16.mxu0 %v2432_v41  ;;  %1860 = vmatprep.subr.bf16.mxu1 %v2435_v42 }
 0x24c   : > { %1820 = vmatpush1.bf16.msra.mxu0 %v2430_v43  ;;  %1861 = vmatpush1.bf16.msra.mxu1 %v2433_v44 }
 0x24d   : > { %1821 = vmatprep.subr.bf16.mxu0 %v2438_v45  ;;  %1862 = vmatprep.subr.bf16.mxu1 %v2441_v46 }
 0x250   : > { %1822 = vmatpush1.bf16.msra.mxu0 %v2436_v47  ;;  %1863 = vmatpush1.bf16.msra.mxu1 %v2439_v48 }
 0x251   : > { %1823 = vmatprep.subr.bf16.mxu0 %v2444_v49  ;;  %1864 = vmatprep.subr.bf16.mxu1 %v2447_v50 }
 0x254   : > { %1824 = vmatpush1.bf16.msra.mxu0 %v2442_v51  ;;  %1865 = vmatpush1.bf16.msra.mxu1 %v2445_v52 }
 0x255   : > { %1825 = vmatprep.subr.bf16.mxu0 %v2450_v53  ;;  %1866 = vmatprep.subr.bf16.mxu1 %v2453_v54 }
 0x258   : > { %1826 = vmatpush1.bf16.msra.mxu0 %v2448_v55  ;;  %1867 = vmatpush1.bf16.msra.mxu1 %v2451_v56 }
 0x2ee   : > { %v1343_v4 = vpop.f32.mrb[0].mxu0  ;;  %v1384_v5 = vpop.f32.mrb[0].mxu1 }
 0x2ef   : > { %v1344_v6 = vadd.f32 %v1343_v4, %v1132_v0  ;;  %v1385_v7 = vadd.f32 %v1384_v5, %v1140_v1  ;;  %v1345_v8 = vpop.f32.mrb[1].mxu0  ;;  %v1386_v9 = vpop.f32.mrb[1].mxu1 }
 0x2f0   : > { %v1346_v10 = vadd.f32 %v1345_v8, %v1136_v2  ;;  %v1387_v11 = vadd.f32 %v1386_v9, %v1144_v3  ;;  %v1347_v12 = vpop.f32.mrb[2].mxu0  ;;  %v1388_v13 = vpop.f32.mrb[2].mxu1 }
 0x2f1   : > { %v1391_v14 = vmax.f32 %v1344_v6, 0.0  ;;  %v1393_v15 = vmax.f32 %v1385_v7, 0.0  ;;  %v1348_v16 = vpop.f32.mrb[3].mxu0  ;;  %v1389_v17 = vpop.f32.mrb[3].mxu1 }
 0x2f2   : > { %v1392_v18 = vmax.f32 %v1346_v10, 0.0  ;;  %v1394_v19 = vmax.f32 %v1387_v11, 0.0 }
 0x2f3   : > { %v1397_v20 = vpack.c.bf16 %v1393_v15, %v1393_v15  ;;  %v1395_v23 = vpack.c.bf16 %v1391_v14, %v1391_v14 }
 0x2f4   : > { %v1396_v21 = vpack.c.bf16 %v1392_v18, %v1392_v18  ;;  %v1398_v22 = vpack.c.bf16 %v1394_v19, %v1394_v19 }
 0x2f6   : > { %1827 = vmatprep.mubr.bf16.mxu0 %v1396_v21  ;;  %1868 = vmatprep.mubr.bf16.mxu1 %v1398_v22 }
 0x2f7   : > { %1828 = vmatmul.mubr.bf16.vlgmr.msra.gmra.mrb[4].mxu0 %v1395_v23  ;;  %1869 = vmatmul.mubr.bf16.vlgmr.msra.gmra.mrb[4].mxu1 %v1397_v20 }
 0x3ca   : > { %v1829_v27 = vpop.f32.mrb[4].mxu0  ;;  %v1870_v28 = vpop.f32.mrb[4].mxu1 }
 0x3cb   : > { %v1830_v29 = vadd.f32 %v1829_v27, %v1468_v25  ;;  %v1831_v30 = vpop.f32.mrb[5].mxu0  ;;  %v1872_v31 = vpop.f32.mrb[5].mxu1 }
 0x3cc   : > { %v1832_v32 = vadd.f32 %v1831_v30, %v1472_v26  ;;  %v1833_v33 = vpop.f32.mrb[6].mxu0  ;;  %v1874_v34 = vpop.f32.mrb[6].mxu1 }
 0x3cd   : > { %v1871_v35 = vadd.f32 %v1870_v28, %v1830_v29  ;;  %v1834_v36 = vpop.f32.mrb[7].mxu0  ;;  %v1875_v37 = vpop.f32.mrb[7].mxu1 }
 0x3ce   : > { %v1873_v38 = vadd.f32 %v1872_v31, %v1832_v32 }
 0x3d0   : > { %v1877_v39 = vmul.f32 1.442695, %v1873_v38 }
 0x3d2   : > { %2454 = vpow2.f32 %v1877_v39 }
 0x3dc   : > { %v2455_v41 = vpop.eup %2454 }
 0x3dd   : > { %v1879_v42 = vmul.f32 %v2455_v41, %v1093_v40 }
 0x3df   : > { %v1880_v43 = vadd.f32 %v1879_v42, %v1871_v35 }
 0x3e1   : > { %1881 = vst [vmem:[%s2754_s5] sm:$0xff] %v1880_v43 }
 0x3e2 PF: > { %s15_s18 = sadd.s32 1, %s2462_s18  }
 0x3e3   : > { %p12_p6 = scmp.ge.s32.totalorder %s15_s18, 4  }
 0x3e5   :  { %14 = sbr.rel (!%p12_p6) target bundleno = 1 (0x1), region = 83 }

</bundles_post_ra>
